<compile_context>
chip_gen: v6e
topology: v6e:2x2x1
jax: 0.10.0
libtpu: 0.0.40
codegen_flags: <defaults>
</compile_context>

<pallas_src>
import functools

import jax
import jax.numpy as jnp
from jax import lax
from jax.experimental import pallas as pl
from jax.experimental.pallas import tpu as pltpu

_EPS = 1e-5

# ---------------------------------------------------------------------------
# One-time probes (module-level cache; never re-run per call).
# ---------------------------------------------------------------------------
_VMEM_CAP = None
_BUFFERED_OK = None


def _vmem_capacity_bytes():
    """Physical VMEM per core (v5e/v6e: 128 MiB, v7x: 64 MiB), probed once."""
    global _VMEM_CAP
    if _VMEM_CAP is None:
        cap = 0
        try:
            cap = int(pltpu.get_tpu_info().vmem_capacity_bytes)
        except Exception:
            cap = 0
        _VMEM_CAP = cap if cap > 0 else 64 * 2 ** 20   # conservative (v7x-sized)
    return _VMEM_CAP


def _buffered_supported():
    """Probe once whether this Pallas build lowers pl.Buffered(1) input specs."""
    global _BUFFERED_OK
    if _BUFFERED_OK is None:
        try:
            spec = pl.BlockSpec((8, 128), lambda i: (0, 0),
                                pipeline_mode=pl.Buffered(1))

            def _probe_kernel(a_ref, o_ref):
                o_ref[...] = a_ref[...] + 1.0

            fn = pl.pallas_call(
                _probe_kernel,
                out_shape=jax.ShapeDtypeStruct((8, 128), jnp.float32),
                grid=(2,),
                in_specs=[spec],
                out_specs=pl.BlockSpec((8, 128), lambda i: (0, 0)),
            )
            jax.jit(fn).lower(jnp.zeros((8, 128), jnp.float32)).compile()
            _BUFFERED_OK = True
        except Exception:
            _BUFFERED_OK = False
    return _BUFFERED_OK


# ---------------------------------------------------------------------------
# Kernel
# ---------------------------------------------------------------------------
def _patch_expand_kernel(x_ref, w_ref, gamma_ref, beta_ref, o_ref, *, precision):
    """Fused expand-Linear + pixel-shuffle rearrange + LayerNorm.

    x_ref     : (tm, dim)        token tile, tm = k * W
    w_ref     : (dim, 2*dim)     expand weight (nn.Linear weight transposed)
    gamma_ref : (1, dim)         LN gamma tiled twice along lanes ([g | g])
    beta_ref  : (1, dim)         LN beta  tiled twice along lanes ([b | b])
    o_ref     : (k, 2, W, dim)   output tile; memory order == (b, h, p1, w, p2, c)
    """
    k, _, w_len, two_c = o_ref.shape          # two_c == dim == 2 * c
    c = two_c // 2

    # Hot path: one MXU matmul per tile, f32 accumulation.
    y = jnp.dot(x_ref[...], w_ref[...],
                preferred_element_type=jnp.float32, precision=precision)
    # Sublane-only reshape (lane dim 4c untouched). Free when W % 8 == 0.
    # TODO(synk): for Swin stages with W % 8 != 0 this reshape costs a relayout;
    # a row-pair-packed output layout would avoid it (perf only, not correctness).
    y = y.reshape(k, w_len, 2 * two_c)

    # Hoisted affine params and lane-half mask (JAX does not CSE broadcast_in_dim).
    gamma = gamma_ref[...].astype(jnp.float32).reshape(1, 1, two_c)
    beta = beta_ref[...].astype(jnp.float32).reshape(1, 1, two_c)
    lane = lax.broadcasted_iota(jnp.int32, (1, 1, two_c), 2)
    in_h0 = lane < c                      # True for the p2=0 half of the 2c lanes
    inv_c = jnp.float32(1.0 / c)

    # Two p1 groups -> two lane-dense (k, W, 2c) stores. Channel slices are taken
    # only at p1*dim lane offsets; per-half (p2) statistics use masked lane
    # reductions so no c-wide slice is materialized. Two-pass variance for
    # numerical stability; normalize+affine is FMA-shaped.
    for p1 in range(2):
        slab = y[:, :, p1 * two_c:(p1 + 1) * two_c]                  # (k, W, 2c)

        s_all = jnp.sum(slab, axis=-1, keepdims=True)
        s_h0 = jnp.sum(jnp.where(in_h0, slab, 0.0), axis=-1, keepdims=True)
        mean0 = s_h0 * inv_c
        mean1 = (s_all - s_h0) * inv_c
        mean_sel = jnp.where(in_h0, mean0, mean1)                    # (k, W, 2c)

        diff = slab - mean_sel
        sq = diff * diff
        q_all = jnp.sum(sq, axis=-1, keepdims=True)
        q_h0 = jnp.sum(jnp.where(in_h0, sq, 0.0), axis=-1, keepdims=True)
        var0 = q_h0 * inv_c
        var1 = (q_all - q_h0) * inv_c
        inv_sel = jnp.where(in_h0,
                            lax.rsqrt(var0 + _EPS),                  # EUP, off VPU
                            lax.rsqrt(var1 + _EPS))

        a = inv_sel * gamma
        # Single full-width 2c store (lane-dense) per p1.
        o_ref[:, p1, :, :] = (diff * a + beta).astype(o_ref.dtype)


# ---------------------------------------------------------------------------
# Tiling / builder
# ---------------------------------------------------------------------------
def _pick_rows_per_tile(rows, w_len, max_tokens, min_steps=2):
    """Largest divisor k of rows with k*W <= max_tokens, >= min_steps grid steps,
    and (k*W) % 8 == 0 where possible (graceful fallbacks)."""
    budget_rows = max(max_tokens // max(w_len, 1), 1)
    divisors = [d for d in range(1, rows + 1) if rows % d == 0]

    def candidates(need_steps, need_align):
        out = []
        for d in divisors:
            if d > budget_rows:
                continue
            if rows // d < need_steps:
                continue
            if need_align and (d * w_len) % 8 != 0 and d != rows:
                continue
            out.append(d)
        return out

    for need_steps, need_align in ((min_steps, True), (min_steps, False),
                                   (1, True), (1, False)):
        cands = candidates(need_steps, need_align)
        if cands:
            return max(cands)
    return 1


@functools.lru_cache(maxsize=64)
def _build_patch_expand(B, H, W, dim, x_dtype, w_dtype, p_dtype,
                        target_tokens, precision):
    rows = B * H                          # number of (b, h) spatial rows
    M = B * H * W                         # total input tokens
    c = dim // 2
    C2 = 2 * dim

    x_dt = jnp.dtype(x_dtype)
    w_dt = jnp.dtype(w_dtype)
    x_isz = x_dt.itemsize
    w_isz = w_dt.itemsize
    out_isz = x_isz

    vmem_cap = _vmem_capacity_bytes()
    buffered = _buffered_supported()
    n_w_bufs = 1 if buffered else 2
    weight_bytes = n_w_bufs * dim * C2 * w_isz

    # Per-token VMEM footprint: double-buffered x tile + double-buffered out tile
    # + f32 matmul result + ~4 full-width f32 epilogue temporaries.
    per_token = (2 * dim * x_isz          # x tile (x2 buffers)
                 + 2 * C2 * out_isz       # out tile (x2 buffers)
                 + C2 * 4                 # f32 matmul result y
                 + 4 * dim * 4)           # epilogue temporaries (diff/sq/selects)

    # Generation-aware token target, clamped by what actually fits with headroom.
    if target_tokens is None:
        target_tokens = 2048 if vmem_cap >= (96 << 20) else 1024
    usable = int(vmem_cap * 0.70) - weight_bytes - (2 << 20)
    max_tokens = max(min(target_tokens, usable // per_token), W)

    k = _pick_rows_per_tile(rows, W, max_tokens)    # >= 2 grid steps when possible
    tm = k * W
    grid = (rows // k,)

    vmem_needed = weight_bytes + tm * per_token + (1 << 20)
    vmem_limit = int(min(vmem_cap * 0.85,
                         max(32 * 2 ** 20, int(vmem_needed * 1.25))))

    cost = pl.CostEstimate(
        flops=2 * M * dim * C2,
        transcendentals=4 * M,                       # one rsqrt per output token
        bytes_accessed=M * dim * x_isz + dim * C2 * w_isz + M * C2 * out_isz,
    )

    w_spec_kwargs = dict(pipeline_mode=pl.Buffered(1)) if buffered else {}

    def kernel(x_ref, w_ref, g_ref, b_ref, o_ref):
        _patch_expand_kernel(x_ref, w_ref, g_ref, b_ref, o_ref,
                             precision=precision)

    call = pl.pallas_call(
        kernel,
        out_shape=jax.ShapeDtypeStruct((rows, 2, W, 2 * c), x_dt),
        grid_spec=pltpu.PrefetchScalarGridSpec(
            num_scalar_prefetch=0,
            grid=grid,
            in_specs=[
                pl.BlockSpec((tm, dim), lambda i: (i, 0)),                   # tokens
                pl.BlockSpec((dim, C2), lambda i: (0, 0), **w_spec_kwargs),  # weight
                pl.BlockSpec((1, dim), lambda i: (0, 0)),                    # gamma x2
                pl.BlockSpec((1, dim), lambda i: (0, 0)),                    # beta  x2
            ],
            out_specs=pl.BlockSpec((k, 2, W, 2 * c), lambda i: (i, 0, 0, 0)),
        ),
        compiler_params=pltpu.CompilerParams(
            dimension_semantics=("parallel",),
            vmem_limit_bytes=vmem_limit),
        cost_estimate=cost,
    )

    def run(x, w_expand, gamma, beta):
        x_flat = x.reshape(M, dim)
        # Tile LN affine params to 2c = dim lanes so the kernel never slices them.
        gamma2 = jnp.concatenate([gamma, gamma]).reshape(1, dim)
        beta2 = jnp.concatenate([beta, beta]).reshape(1, dim)
        out4 = call(x_flat, w_expand, gamma2, beta2)
        # (B*H, 2, W, 2c) memory order == (b, (h p1), (w p2), c): metadata reshape.
        return out4.reshape(B, 4 * H * W, c)

    return jax.jit(run)


def patch_expand(x, w_expand, gamma, beta, input_resolution,
                 target_block_tokens=None, precision=None):
    """Forward pass of Swin `PatchExpand` (dim_scale=2).

    x        : (B, H*W, dim)
    w_expand : (dim, 2*dim)  -- transpose of nn.Linear(dim, 2*dim, bias=False).weight
    gamma    : (dim//2,)     -- LayerNorm weight
    beta     : (dim//2,)     -- LayerNorm bias
    precision: matmul precision (None = TPU default; lax.Precision.HIGHEST for
               f32 parity with PyTorch at a compute cost).
    returns  : (B, 4*H*W, dim//2)
    """
    H, W = input_resolution
    B, L, dim = x.shape
    assert L == H * W, "input feature has wrong size"
    assert dim % 2 == 0, "dim must be even"
    fn = _build_patch_expand(
        B, H, W, dim,
        jnp.dtype(x.dtype).name, jnp.dtype(w_expand.dtype).name,
        jnp.dtype(gamma.dtype).name, target_block_tokens, precision)
    return fn(x, w_expand, gamma, beta)


# ---------------------------------------------------------------------------
# Pure-JAX reference of the PyTorch forward
# ---------------------------------------------------------------------------
def _reference(x, w_expand, gamma, beta, input_resolution):
    H, W = input_resolution
    y = jnp.einsum("blk,kc->blc", x, w_expand)
    B, L, C = y.shape
    c = C // 4
    y = y.reshape(B, H, W, 2, 2, c).transpose(0, 1, 3, 2, 4, 5).reshape(B, -1, c)
    mean = y.mean(-1, keepdims=True)
    var = ((y - mean) ** 2).mean(-1, keepdims=True)
    return (y - mean) / jnp.sqrt(var + _EPS) * gamma + beta


if __name__ == "__main__":
    B, H, W, dim = 2, 8, 8, 64   # x: (B, H*W, dim) = (2, 64, 64)
    key = jax.random.PRNGKey(0)
    kx, kw, kg, kb = jax.random.split(key, 4)

    x = jax.random.normal(kx, (B, H * W, dim), dtype=jnp.float32)
    # nn.Linear(dim, 2*dim, bias=False): weight is (2*dim, dim); we store W^T.
    w_expand = jax.random.normal(kw, (dim, 2 * dim), dtype=jnp.float32) * 0.02
    # nn.LayerNorm(dim // 2) affine params (perturbed from defaults for a real test).
    gamma = 1.0 + 0.1 * jax.random.normal(kg, (dim // 2,), dtype=jnp.float32)
    beta = 0.1 * jax.random.normal(kb, (dim // 2,), dtype=jnp.float32)

    out = patch_expand(x, w_expand, gamma, beta, (H, W))
    out = jax.block_until_ready(out)

    ref = _reference(x, w_expand, gamma, beta, (H, W))
    assert out.shape == (B, 4 * H * W, dim // 2), out.shape
    assert jnp.allclose(out, ref, atol=1e-4, rtol=1e-4), "mismatch vs reference"
    print("KERNEL_OK")
</pallas_src>

<mosaic_0001>
module attributes {stable_mosaic.version = 11 : i64} {
  func.func @kernel(%arg0: i32, %arg1: memref<64x64xf32, #tpu.memory_space<vmem>>, %arg2: memref<64x128xf32, #tpu.memory_space<vmem>>, %arg3: memref<1x64xf32, #tpu.memory_space<vmem>>, %arg4: memref<1x64xf32, #tpu.memory_space<vmem>>, %arg5: memref<8x2x8x64xf32, #tpu.memory_space<vmem>>) attributes {dimension_semantics = [#tpu.dimension_semantics<parallel>], iteration_bounds = array<i64: 2>, scalar_prefetch = 0 : i64, scratch_operands = 0 : i64, tpu.core_type = #tpu.core_type<tc>, window_params = [{transform_indices = @transform_0, window_bounds = array<i64: 64, 64>}, {pipeline_mode = #tpu.pipeline_mode<synchronous>, transform_indices = @transform_1, window_bounds = array<i64: 64, 128>}, {pipeline_mode = #tpu.pipeline_mode<synchronous>, transform_indices = @transform_2, window_bounds = array<i64: 1, 64>}, {pipeline_mode = #tpu.pipeline_mode<synchronous>, transform_indices = @transform_3, window_bounds = array<i64: 1, 64>}, {transform_indices = @transform_4, window_bounds = array<i64: 8, 2, 8, 64>}]} {
    %c0 = arith.constant 0 : index
    %c0_0 = arith.constant 0 : index
    %0 = vector.load %arg1[%c0, %c0_0] : memref<64x64xf32, #tpu.memory_space<vmem>>, vector<64x64xf32>
    %c0_1 = arith.constant 0 : index
    %c0_2 = arith.constant 0 : index
    %1 = vector.load %arg2[%c0_1, %c0_2] : memref<64x128xf32, #tpu.memory_space<vmem>>, vector<64x128xf32>
    %cst = arith.constant dense<0.000000e+00> : vector<64x128xf32>
    %2 = tpu.matmul %0, %1, %cst {dimension_numbers = #tpu.dot_dimension_numbers<[1], [0], [0], [1], [0, 0, 1, 1], [], []>} : vector<64x64xf32>, vector<64x128xf32>, vector<64x128xf32> -> vector<64x128xf32>
    %3 = vector.shape_cast %2 : vector<64x128xf32> to vector<8x8x128xf32>
    %c0_3 = arith.constant 0 : index
    %c0_4 = arith.constant 0 : index
    %4 = vector.load %arg3[%c0_3, %c0_4] : memref<1x64xf32, #tpu.memory_space<vmem>>, vector<1x64xf32>
    %5 = vector.shape_cast %4 : vector<1x64xf32> to vector<1x1x64xf32>
    %c0_5 = arith.constant 0 : index
    %c0_6 = arith.constant 0 : index
    %6 = vector.load %arg4[%c0_5, %c0_6] : memref<1x64xf32, #tpu.memory_space<vmem>>, vector<1x64xf32>
    %7 = vector.shape_cast %6 : vector<1x64xf32> to vector<1x1x64xf32>
    %8 = tpu.iota {dimensions = array<i32: 2>} : vector<1x1x64xi32>
    %c32_i32 = arith.constant 32 : i32
    %9 = vector.broadcast %c32_i32 : i32 to vector<1x1x64xi32>
    %10 = arith.cmpi slt, %8, %9 : vector<1x1x64xi32>
    %11 = vector.extract_strided_slice %3 {offsets = [0, 0, 0], sizes = [8, 8, 64], strides = [1, 1, 1]} : vector<8x8x128xf32> to vector<8x8x64xf32>
    %cst_7 = arith.constant dense<0.000000e+00> : vector<8x8xf32>
    %12 = vector.multi_reduction <add>, %11, %cst_7 [2] : vector<8x8x64xf32> to vector<8x8xf32>
    %13 = vector.shape_cast %12 : vector<8x8xf32> to vector<8x8x1xf32>
    %cst_8 = arith.constant 0.000000e+00 : f32
    %14 = vector.shape_cast %10 : vector<1x1x64xi1> to vector<1x1x64xi1>
    %15 = vector.broadcast %14 : vector<1x1x64xi1> to vector<8x8x64xi1>
    %16 = vector.broadcast %cst_8 : f32 to vector<8x8x64xf32>
    %17 = arith.select %15, %11, %16 : vector<8x8x64xi1>, vector<8x8x64xf32>
    %cst_9 = arith.constant dense<0.000000e+00> : vector<8x8xf32>
    %18 = vector.multi_reduction <add>, %17, %cst_9 [2] : vector<8x8x64xf32> to vector<8x8xf32>
    %19 = vector.shape_cast %18 : vector<8x8xf32> to vector<8x8x1xf32>
    %cst_10 = arith.constant 3.125000e-02 : f32
    %20 = vector.broadcast %cst_10 : f32 to vector<8x8x1xf32>
    %21 = arith.mulf %19, %20 : vector<8x8x1xf32>
    %22 = arith.subf %13, %19 : vector<8x8x1xf32>
    %cst_11 = arith.constant 3.125000e-02 : f32
    %23 = vector.broadcast %cst_11 : f32 to vector<8x8x1xf32>
    %24 = arith.mulf %22, %23 : vector<8x8x1xf32>
    %25 = vector.shape_cast %10 : vector<1x1x64xi1> to vector<1x1x64xi1>
    %26 = vector.broadcast %25 : vector<1x1x64xi1> to vector<8x8x64xi1>
    %27 = vector.shape_cast %21 : vector<8x8x1xf32> to vector<8x8x1xf32>
    %28 = vector.broadcast %27 : vector<8x8x1xf32> to vector<8x8x64xf32>
    %29 = vector.shape_cast %24 : vector<8x8x1xf32> to vector<8x8x1xf32>
    %30 = vector.broadcast %29 : vector<8x8x1xf32> to vector<8x8x64xf32>
    %31 = arith.select %26, %28, %30 : vector<8x8x64xi1>, vector<8x8x64xf32>
    %32 = arith.subf %11, %31 : vector<8x8x64xf32>
    %33 = arith.mulf %32, %32 : vector<8x8x64xf32>
    %cst_12 = arith.constant dense<0.000000e+00> : vector<8x8xf32>
    %34 = vector.multi_reduction <add>, %33, %cst_12 [2] : vector<8x8x64xf32> to vector<8x8xf32>
    %35 = vector.shape_cast %34 : vector<8x8xf32> to vector<8x8x1xf32>
    %cst_13 = arith.constant 0.000000e+00 : f32
    %36 = vector.shape_cast %10 : vector<1x1x64xi1> to vector<1x1x64xi1>
    %37 = vector.broadcast %36 : vector<1x1x64xi1> to vector<8x8x64xi1>
    %38 = vector.broadcast %cst_13 : f32 to vector<8x8x64xf32>
    %39 = arith.select %37, %33, %38 : vector<8x8x64xi1>, vector<8x8x64xf32>
    %cst_14 = arith.constant dense<0.000000e+00> : vector<8x8xf32>
    %40 = vector.multi_reduction <add>, %39, %cst_14 [2] : vector<8x8x64xf32> to vector<8x8xf32>
    %41 = vector.shape_cast %40 : vector<8x8xf32> to vector<8x8x1xf32>
    %cst_15 = arith.constant 3.125000e-02 : f32
    %42 = vector.broadcast %cst_15 : f32 to vector<8x8x1xf32>
    %43 = arith.mulf %41, %42 : vector<8x8x1xf32>
    %44 = arith.subf %35, %41 : vector<8x8x1xf32>
    %cst_16 = arith.constant 3.125000e-02 : f32
    %45 = vector.broadcast %cst_16 : f32 to vector<8x8x1xf32>
    %46 = arith.mulf %44, %45 : vector<8x8x1xf32>
    %cst_17 = arith.constant 9.99999974E-6 : f32
    %47 = vector.broadcast %cst_17 : f32 to vector<8x8x1xf32>
    %48 = arith.addf %43, %47 : vector<8x8x1xf32>
    %49 = math.rsqrt %48 : vector<8x8x1xf32>
    %cst_18 = arith.constant 9.99999974E-6 : f32
    %50 = vector.broadcast %cst_18 : f32 to vector<8x8x1xf32>
    %51 = arith.addf %46, %50 : vector<8x8x1xf32>
    %52 = math.rsqrt %51 : vector<8x8x1xf32>
    %53 = vector.shape_cast %10 : vector<1x1x64xi1> to vector<1x1x64xi1>
    %54 = vector.broadcast %53 : vector<1x1x64xi1> to vector<8x8x64xi1>
    %55 = vector.shape_cast %49 : vector<8x8x1xf32> to vector<8x8x1xf32>
    %56 = vector.broadcast %55 : vector<8x8x1xf32> to vector<8x8x64xf32>
    %57 = vector.shape_cast %52 : vector<8x8x1xf32> to vector<8x8x1xf32>
    %58 = vector.broadcast %57 : vector<8x8x1xf32> to vector<8x8x64xf32>
    %59 = arith.select %54, %56, %58 : vector<8x8x64xi1>, vector<8x8x64xf32>
    %60 = vector.broadcast %5 : vector<1x1x64xf32> to vector<8x8x64xf32>
    %61 = arith.mulf %59, %60 : vector<8x8x64xf32>
    %62 = arith.mulf %32, %61 : vector<8x8x64xf32>
    %63 = vector.broadcast %7 : vector<1x1x64xf32> to vector<8x8x64xf32>
    %64 = arith.addf %62, %63 : vector<8x8x64xf32>
    %c0_19 = arith.constant 0 : index
    %c0_20 = arith.constant 0 : index
    %c0_21 = arith.constant 0 : index
    %c0_22 = arith.constant 0 : index
    %65 = vector.load %arg5[%c0_19, %c0_20, %c0_21, %c0_22] : memref<8x2x8x64xf32, #tpu.memory_space<vmem>>, vector<8x1x8x64xf32>
    %66 = vector.shape_cast %65 : vector<8x1x8x64xf32> to vector<8x8x64xf32>
    %67 = vector.shape_cast %64 : vector<8x8x64xf32> to vector<8x1x8x64xf32>
    tpu.vector_store %arg5[%c0_19, %c0_20, %c0_21, %c0_22], %67 {strides = array<i32>} : memref<8x2x8x64xf32, #tpu.memory_space<vmem>>, vector<8x1x8x64xf32>,
    %68 = vector.extract_strided_slice %3 {offsets = [0, 0, 64], sizes = [8, 8, 64], strides = [1, 1, 1]} : vector<8x8x128xf32> to vector<8x8x64xf32>
    %cst_23 = arith.constant dense<0.000000e+00> : vector<8x8xf32>
    %69 = vector.multi_reduction <add>, %68, %cst_23 [2] : vector<8x8x64xf32> to vector<8x8xf32>
    %70 = vector.shape_cast %69 : vector<8x8xf32> to vector<8x8x1xf32>
    %cst_24 = arith.constant 0.000000e+00 : f32
    %71 = vector.shape_cast %10 : vector<1x1x64xi1> to vector<1x1x64xi1>
    %72 = vector.broadcast %71 : vector<1x1x64xi1> to vector<8x8x64xi1>
    %73 = vector.broadcast %cst_24 : f32 to vector<8x8x64xf32>
    %74 = arith.select %72, %68, %73 : vector<8x8x64xi1>, vector<8x8x64xf32>
    %cst_25 = arith.constant dense<0.000000e+00> : vector<8x8xf32>
    %75 = vector.multi_reduction <add>, %74, %cst_25 [2] : vector<8x8x64xf32> to vector<8x8xf32>
    %76 = vector.shape_cast %75 : vector<8x8xf32> to vector<8x8x1xf32>
    %cst_26 = arith.constant 3.125000e-02 : f32
    %77 = vector.broadcast %cst_26 : f32 to vector<8x8x1xf32>
    %78 = arith.mulf %76, %77 : vector<8x8x1xf32>
    %79 = arith.subf %70, %76 : vector<8x8x1xf32>
    %cst_27 = arith.constant 3.125000e-02 : f32
    %80 = vector.broadcast %cst_27 : f32 to vector<8x8x1xf32>
    %81 = arith.mulf %79, %80 : vector<8x8x1xf32>
    %82 = vector.shape_cast %10 : vector<1x1x64xi1> to vector<1x1x64xi1>
    %83 = vector.broadcast %82 : vector<1x1x64xi1> to vector<8x8x64xi1>
    %84 = vector.shape_cast %78 : vector<8x8x1xf32> to vector<8x8x1xf32>
    %85 = vector.broadcast %84 : vector<8x8x1xf32> to vector<8x8x64xf32>
    %86 = vector.shape_cast %81 : vector<8x8x1xf32> to vector<8x8x1xf32>
    %87 = vector.broadcast %86 : vector<8x8x1xf32> to vector<8x8x64xf32>
    %88 = arith.select %83, %85, %87 : vector<8x8x64xi1>, vector<8x8x64xf32>
    %89 = arith.subf %68, %88 : vector<8x8x64xf32>
    %90 = arith.mulf %89, %89 : vector<8x8x64xf32>
    %cst_28 = arith.constant dense<0.000000e+00> : vector<8x8xf32>
    %91 = vector.multi_reduction <add>, %90, %cst_28 [2] : vector<8x8x64xf32> to vector<8x8xf32>
    %92 = vector.shape_cast %91 : vector<8x8xf32> to vector<8x8x1xf32>
    %cst_29 = arith.constant 0.000000e+00 : f32
    %93 = vector.shape_cast %10 : vector<1x1x64xi1> to vector<1x1x64xi1>
    %94 = vector.broadcast %93 : vector<1x1x64xi1> to vector<8x8x64xi1>
    %95 = vector.broadcast %cst_29 : f32 to vector<8x8x64xf32>
    %96 = arith.select %94, %90, %95 : vector<8x8x64xi1>, vector<8x8x64xf32>
    %cst_30 = arith.constant dense<0.000000e+00> : vector<8x8xf32>
    %97 = vector.multi_reduction <add>, %96, %cst_30 [2] : vector<8x8x64xf32> to vector<8x8xf32>
    %98 = vector.shape_cast %97 : vector<8x8xf32> to vector<8x8x1xf32>
    %cst_31 = arith.constant 3.125000e-02 : f32
    %99 = vector.broadcast %cst_31 : f32 to vector<8x8x1xf32>
    %100 = arith.mulf %98, %99 : vector<8x8x1xf32>
    %101 = arith.subf %92, %98 : vector<8x8x1xf32>
    %cst_32 = arith.constant 3.125000e-02 : f32
    %102 = vector.broadcast %cst_32 : f32 to vector<8x8x1xf32>
    %103 = arith.mulf %101, %102 : vector<8x8x1xf32>
    %cst_33 = arith.constant 9.99999974E-6 : f32
    %104 = vector.broadcast %cst_33 : f32 to vector<8x8x1xf32>
    %105 = arith.addf %100, %104 : vector<8x8x1xf32>
    %106 = math.rsqrt %105 : vector<8x8x1xf32>
    %cst_34 = arith.constant 9.99999974E-6 : f32
    %107 = vector.broadcast %cst_34 : f32 to vector<8x8x1xf32>
    %108 = arith.addf %103, %107 : vector<8x8x1xf32>
    %109 = math.rsqrt %108 : vector<8x8x1xf32>
    %110 = vector.shape_cast %10 : vector<1x1x64xi1> to vector<1x1x64xi1>
    %111 = vector.broadcast %110 : vector<1x1x64xi1> to vector<8x8x64xi1>
    %112 = vector.shape_cast %106 : vector<8x8x1xf32> to vector<8x8x1xf32>
    %113 = vector.broadcast %112 : vector<8x8x1xf32> to vector<8x8x64xf32>
    %114 = vector.shape_cast %109 : vector<8x8x1xf32> to vector<8x8x1xf32>
    %115 = vector.broadcast %114 : vector<8x8x1xf32> to vector<8x8x64xf32>
    %116 = arith.select %111, %113, %115 : vector<8x8x64xi1>, vector<8x8x64xf32>
    %117 = vector.broadcast %5 : vector<1x1x64xf32> to vector<8x8x64xf32>
    %118 = arith.mulf %116, %117 : vector<8x8x64xf32>
    %119 = arith.mulf %89, %118 : vector<8x8x64xf32>
    %120 = vector.broadcast %7 : vector<1x1x64xf32> to vector<8x8x64xf32>
    %121 = arith.addf %119, %120 : vector<8x8x64xf32>
    %c0_35 = arith.constant 0 : index
    %c1 = arith.constant 1 : index
    %c0_36 = arith.constant 0 : index
    %c0_37 = arith.constant 0 : index
    %122 = vector.load %arg5[%c0_35, %c1, %c0_36, %c0_37] : memref<8x2x8x64xf32, #tpu.memory_space<vmem>>, vector<8x1x8x64xf32>
    %123 = vector.shape_cast %122 : vector<8x1x8x64xf32> to vector<8x8x64xf32>
    %124 = vector.shape_cast %121 : vector<8x8x64xf32> to vector<8x1x8x64xf32>
    tpu.vector_store %arg5[%c0_35, %c1, %c0_36, %c0_37], %124 {strides = array<i32>} : memref<8x2x8x64xf32, #tpu.memory_space<vmem>>, vector<8x1x8x64xf32>,
    return
  }
  func.func @transform_0(%arg0: i32) -> (i32, i32) {
    %c0_i32 = arith.constant 0 : i32
    %c0_i32_0 = arith.constant 0 : i32
    return %arg0, %c0_i32 : i32, i32
  }
  func.func @transform_1(%arg0: i32) -> (i32, i32) {
    %c0_i32 = arith.constant 0 : i32
    %c0_i32_0 = arith.constant 0 : i32
    %c0_i32_1 = arith.constant 0 : i32
    return %c0_i32, %c0_i32_0 : i32, i32
  }
  func.func @transform_2(%arg0: i32) -> (i32, i32) {
    %c0_i32 = arith.constant 0 : i32
    %c0_i32_0 = arith.constant 0 : i32
    %c0_i32_1 = arith.constant 0 : i32
    return %c0_i32, %c0_i32_0 : i32, i32
  }
  func.func @transform_3(%arg0: i32) -> (i32, i32) {
    %c0_i32 = arith.constant 0 : i32
    %c0_i32_0 = arith.constant 0 : i32
    %c0_i32_1 = arith.constant 0 : i32
    return %c0_i32, %c0_i32_0 : i32, i32
  }
  func.func @transform_4(%arg0: i32) -> (i32, i32, i32, i32) {
    %c0_i32 = arith.constant 0 : i32
    %c0_i32_0 = arith.constant 0 : i32
    %c0_i32_1 = arith.constant 0 : i32
    %c0_i32_2 = arith.constant 0 : i32
    return %arg0, %c0_i32, %c0_i32_0, %c0_i32_1 : i32, i32, i32, i32
  }
}

</mosaic_0001>

<bundles_post_ra>
// kernel: run.1
= control target key start
LH: loop header
LB: loop body
LE: loop exit
PB: predicated region body
PF: predicated region fallthrough
CT: control target
= control target key end

     0   :  { %9 = vsyncpa [#allocation3], 0  ;;  %s2184_s0 = inlined_call_operand.hbm [shape: f32[128,64], index: 0, kind: input, shape index: {}]   ;;  %s2185_s1 = inlined_call_operand.hbm [shape: f32[64,128], index: 1, kind: input, shape index: {}]   ;;  %s2186_s2 = inlined_call_operand.vmem [shape: f32[1,64], index: 2, kind: input, shape index: {}]   ;;  %s2187_s3 = inlined_call_operand.vmem [shape: f32[1,64], index: 3, kind: input, shape index: {}]   ;;  %s2188_s4 = inlined_call_operand.vmem [shape: f32[16,2,8,64], index: 4, kind: output, shape index: {}]  }
   0x1   :  { %11 = vsyncpa [#allocation3 + $0x1], 0 }
   0x2   :  { %12 = vsyncpa [#allocation5], 0  ;;  %s1494_s15 = smov 0   ;;  %s1496_s16 = smov 0  }
   0x3   :  { %s1498_s17 = smov 0   ;;  %s1500_s18 = smov 0  }
   0x4 LB: > { %s1157_s19 = sadd.s32 4294967295, %s1462_s18   ;;  %p38_p0 = scmp.ne.s32.totalorder %s1454_s16, %s1450_s15  ;;  %s1462_s18 = sphi %s1500_s18, %s2204_s18   ;;  %s1458_s17 = sphi %s1498_s17, %s2203_s17   ;;  %s1454_s16 = sphi %s1496_s16, %s2202_s16   ;;  %s1450_s15 = sphi %s1494_s15, %s2201_s15  }
   0x5   : > { %p1516_p1 = scmp.eq.s32.totalorder %s1157_s19, 0  ;;  %p1159_p2 = scmp.ge.s32.totalorder %s1462_s18, 1 }
   0x6   : > { %p138_p3 = scmp.lt.s32.totalorder %s1462_s18, 3  ;;  %s1464_s23 = smov [#allocation4]  }
   0x7   : > { %s2193_s20 = scalar_select %p1516_p1, 1, 0 }
   0x8   : > { %p1524_p4 = por %p1516_p1, %p38_p0  ;;  %p1528_p5 = pnand %p1159_p2, %p138_p3 }
   0x9   : > { %s150_s24 = sshll.u32 %s1464_s23, 4  ;;  %s1541_s26 = sadd.s32 1, %s1462_s18   ;;  %s151_s24 = int_to_ptr.vmem [resolvable:$true] %s150_s24 }
   0xa   : > { %s2194_s21 = scalar_select %p1524_p4, 1, 0 }
   0xb   : > { %s2195_s22 = scalar_select %p1528_p5, 1, 0 }
   0xc   : > { %p1259_p6 = pneg %p1528_p5  ;;  %s25_s27 = sadd.s32 1, %s1458_s17 }
   0xd   : > { %s22_s28 = ssub.s32 %s1462_s18, %s1541_s26  ;;  %s1381_s29 = scalar_lea.vmem %s151_s24, 1024 }
   0xe   : > { %p1536_p7 = pnand %p1259_p6, %p1516_p1  ;;  %p1382_p9 = scmp.ne.s32.totalorder %s151_s24, %s1381_s29 }
   0xf   : > { %p1389_p12 = scmp.lt.s32.totalorder %s151_s24, %s151_s24  ;;  %p1390_p13 = scmp.lt.s32.totalorder %s1381_s29, %s1381_s29 }
  0x10   : > { %p1372_p8 = pneg %p1536_p7 }
  0x11   : > { %p1391_p0 = por %p1390_p13, %p1389_p12 }
  0x12   : > { %p1384_p10 = pnand %p1382_p9, %p1372_p8 }
  0x14   : > { %p1385_p11 = pneg %p1384_p10 }
  0x16   : > { %p1392_p2 = pnand %p1391_p0, %p1385_p11 }
  0x18   : > { %1395 = shalt.err (!%p1392_p2)
}
  0x19   : > { %s1465_s30 = smov 128   ;;  %s1466_s5 = smov 8  }
  0x1a   : > { %1262 = dma.hbm_to_vmem [thread:$0]  (!%p1536_p7), %s2185_s1, 1024, %s151_s24, [#allocation5], %s1465_s30, %s1465_s30, %s1466_s5  }
  0x1b   : > { %p23_p3 = scmp.eq.s32.totalorder %s22_s28, 0  ;;  %p32_p6 = scmp.ne.s32.totalorder %s1458_s17, %s1454_s16 }
  0x1c   : > { %p33_p8 = scmp.eq.s32.totalorder %s1462_s18, 0  ;;  %p1268_p9 = scmp.lt.s32.totalorder %s1462_s18, 2 }
  0x1d   : > { %s1561_s8 = scalar_select %p23_p3, %s1458_s17, %s25_s27  }
  0x1e   : > { %p34_p10 = por %p33_p8, %p32_p6  ;;  %s170_s9 = sand.u32 1, %s1458_s17  }
  0x1f   : > { %s1162_s10 = sshll.u32 %s170_s9, 6  ;;  %s1191_s11 = sshll.u32 %s1462_s18, 10 }
  0x20   : > { %s1568_s14 = scalar_lea.hbm %s2184_s0, %s1191_s11  ;;  %s174_s15 = scalar_lea.vmem [#allocation2], %s1162_s10 }
  0x21   : > { %s181_s23 = sshll.u32 %s174_s15, 4  ;;  %p1572_p7 = pnand %p1268_p9, %p34_p10  ;;  %s1570_s23 = int_to_ptr.vmem [resolvable:$true] %s181_s23 }
  0x22   : > { %s1576_s25 = scalar_lea.sflag [#allocation3], %s170_s9  ;;  %s1396_s27 = scalar_lea.hbm %s1568_s14, 1024 }
  0x23   : > { %p1397_p11 = scmp.ne.s32.totalorder %s1568_s14, %s1396_s27  ;;  %p1398_p12 = pneg %p1572_p7 }
  0x24   : > { %s1401_s6 = scalar_lea.hbm %s2184_s0, 2048  ;;  %p1402_p2 = scmp.lt.s32.totalorder %s1568_s14, %s2184_s0 }
  0x25   : > { %p1399_p13 = pnand %p1398_p12, %p1397_p11  ;;  %p1403_p3 = scmp.lt.s32.totalorder %s1401_s6, %s1396_s27 }
  0x27   : > { %p1400_p0 = pneg %p1399_p13  ;;  %p1404_p6 = por %p1403_p3, %p1402_p2 }
  0x29   : > { %p1405_p8 = pnand %p1404_p6, %p1400_p0 }
  0x2b   : > { %1408 = shalt.err (!%p1405_p8)
}
  0x2c   : > { %s1409_s9 = scalar_lea.vmem %s1570_s23, 1024  ;;  %s1467_s11 = smov [#allocation2]  }
  0x2d   : > { %p1410_p9 = scmp.ne.s32.totalorder %s1570_s23, %s1409_s9  ;;  %s1414_s12 = sshll.u32 %s1467_s11, 4  ;;  %s1415_s12 = int_to_ptr.vmem [resolvable:$false] %s1414_s12 }
  0x2e   : > { %s1416_s13 = scalar_lea.vmem %s1415_s12, 2048  ;;  %p1417_p13 = scmp.lt.s32.totalorder %s1570_s23, %s1415_s12 }
  0x2f   : > { %p1412_p10 = pnand %p1410_p9, %p1398_p12  ;;  %p1418_p1 = scmp.lt.s32.totalorder %s1416_s13, %s1409_s9 }
  0x31   : > { %p1413_p11 = pneg %p1412_p10  ;;  %p1419_p4 = por %p1418_p1, %p1417_p13 }
  0x33   : > { %p1420_p5 = pnand %p1419_p4, %p1413_p11 }
  0x35   : > { %1423 = shalt.err (!%p1420_p5)
}
  0x36   : > { %1266 = dma.hbm_to_vmem [thread:$0]  (!%p1572_p7), %s1568_s14, 1024, %s1570_s23, %s1576_s25, %s1465_s30, %s1465_s30, %s1466_s5  }
  0x37   : > { %p2198_p12 = scmp.ne.s32.totalorder %s2195_s22, 0 }
  0x38   : > { %s195_s15 = sand.u32 (!%p2198_p12), 1, %s1454_s16   ;;  %p2199_p1 = scmp.ne.s32.totalorder (!%p2198_p12), %s2194_s21, 0 }
  0x39   : > { %193 = sbr.rel (%p2198_p12) target bundleno = 1319 (0x527), region = 36  ;;  %s1166_s27 = sshll.u32 (!%p2198_p12), %s195_s15, 6 }
  0x3a   : > { %s196_s28 = scalar_lea.sflag (!%p2198_p12), [#allocation3], %s195_s15  ;;  %s1603_s29 = scalar_lea.vmem (!%p2198_p12), [#allocation2], %s1166_s27 }
  0x3e   : > { %1441 = dma.done.wait (%p2199_p1), %s196_s28, 1024  }
  0x3f   : > { %1443 = vsyncadd (%p2199_p1), %s196_s28, 4294966272  ;;  %p2200_p4 = scmp.ne.s32.totalorder %s2193_s20, 0 }
  0x41   : > { %1445 = dma.done.wait (%p2200_p4), [#allocation5], 1024  }
  0x42   : > { %1447 = vsyncadd (%p2200_p4), [#allocation5], 4294966272  ;;  %v252_v0 = vld [vmem:[#allocation4 + $0x38] sm:$0xff]  ;;  %v251_v1 = vld [vmem:[#allocation4 + $0x30] sm:$0xff]  ;;  %vm253_vm0 = vcmask 523264   ;;  %s1468_s20 = smov 64   ;;  %v385_v24 = vlaneseq }
  0x43   : > { %1209 = vmatprep.subr.mxu0 %v252_v0  ;;  %1237 = vmatprep.subr.mxu1 %v252_v0  ;;  %v250_v2 = vld [vmem:[#allocation4 + $0x28] sm:$0xff]  ;;  %v249_v3 = vld [vmem:[#allocation4 + $0x20] sm:$0xff]  ;;  %v248_v4 = vld [vmem:[#allocation4 + $0x18] sm:$0xff]  ;;  %s1168_s14 = sshll.u32 %s1157_s19, 3 }
  0x44   : > { %1210 = vmatpush3.msra.mxu0 %v252_v0  ;;  %1245 = vmatpush3.msra.mxu1 %v252_v0  ;;  %v247_v5 = vld [vmem:[#allocation4 + $0x10] sm:$0xff]  ;;  %v246_v6 = vld [vmem:[#allocation4 + $0x8] sm:$0xff]  ;;  %v245_v7 = vld [vmem:[#allocation4] sm:$0xff]  ;;  %v1661_v25 = vand.u32 127, %v385_v24  ;;  %p231_p5 = scmp.lt.s32.totalorder %s1168_s14, 15 }
  0x45   : > { %1211 = vmatprep.subr.mxu0 %v251_v1  ;;  %1238 = vmatprep.subr.mxu1 %v251_v1  ;;  %v237_v8 = vld [vmem:[%s1603_s29] sm:$0xff]  ;;  %v238_v10 = vld [vmem:[%s1603_s29 + $0x8] sm:$0xff]  ;;  %v239_v12 = vld [vmem:[%s1603_s29 + $0x10] sm:$0xff] }
  0x46   : > { %1212 = vmatpush3.msra.mxu0 %v251_v1  ;;  %1246 = vmatpush3.msra.mxu1 %v251_v1  ;;  %v241_v9 = vld [vmem:[%s1603_s29 + $0x20] sm:$0xff]  ;;  %v242_v11 = vld [vmem:[%s1603_s29 + $0x28] sm:$0xff]  ;;  %v243_v13 = vld [vmem:[%s1603_s29 + $0x30] sm:$0xff]  ;;  %vm387_vm1 = vcmp.lt.s32.totalorder %v1661_v25, 32  ;;  %s2206_s14 = smov (!%p231_p5, %s1168_s14), 15 }
  0x47   : > { %1213 = vmatprep.subr.mxu0 %v250_v2  ;;  %1239 = vmatprep.subr.mxu1 %v250_v2  ;;  %v240_v14 = vld [vmem:[%s1603_s29 + $0x18] sm:$0xff]  ;;  %s1192_s18 = sshll.u32 %s2206_s14, 4 }
  0x48   : > { %1214 = vmatpush3.msra.mxu0 %v250_v2  ;;  %1247 = vmatpush3.msra.mxu1 %v250_v2  ;;  %v244_v15 = vld [vmem:[%s1603_s29 + $0x38] sm:$0xff]  ;;  %s2084_s24 = scalar_lea.vmem %s2188_s4, %s1192_s18 }
  0x49   : > { %1215 = vmatprep.subr.mxu0 %v249_v3  ;;  %1240 = vmatprep.subr.mxu1 %v249_v3 }
  0x4a   : > { %1216 = vmatpush3.msra.mxu0 %v249_v3  ;;  %1248 = vmatpush3.msra.mxu1 %v249_v3 }
  0x4b   : > { %1217 = vmatprep.subr.mxu0 %v248_v4  ;;  %1241 = vmatprep.subr.mxu1 %v248_v4 }
  0x4c   : > { %1218 = vmatpush3.msra.mxu0 %v248_v4  ;;  %1249 = vmatpush3.msra.mxu1 %v248_v4 }
  0x4d   : > { %1219 = vmatprep.subr.mxu0 %v247_v5  ;;  %1242 = vmatprep.subr.mxu1 %v247_v5 }
  0x4e   : > { %1220 = vmatpush3.msra.mxu0 %v247_v5  ;;  %1250 = vmatpush3.msra.mxu1 %v247_v5 }
  0x4f   : > { %1221 = vmatprep.subr.mxu0 %v246_v6  ;;  %1243 = vmatprep.subr.mxu1 %v246_v6 }
  0x50   : > { %1222 = vmatpush3.msra.mxu0 %v246_v6  ;;  %1251 = vmatpush3.msra.mxu1 %v246_v6 }
  0x51   : > { %1223 = vmatprep.subr.mxu0 %v245_v7  ;;  %1244 = vmatprep.subr.mxu1 %v245_v7 }
  0x52   : > { %1224 = vmatpush3.msra.mxu0 %v245_v7  ;;  %1252 = vmatpush3.msra.mxu1 %v245_v7 }
  0x53   : > { %1225 = vmatprep.mubr.msk.f32.mxu0 %vm253_vm0, %v237_v8  ;;  %1231 = vmatprep.mubr.msk.f32.mxu1 %vm253_vm0, %v241_v9 }
  0x54   : > { %1226 = vmatmul.mubr.msk.f32.vlgmr.msra.gmra.mxu0 %vm253_vm0, %v238_v10  ;;  %1232 = vmatmul.mubr.msk.f32.vlgmr.msra.gmra.mxu1 %vm253_vm0, %v242_v11 }
  0x55   : > { %1228 = vmatprep.mubr.msk.f32.mxu0 %vm253_vm0, %v239_v12  ;;  %1234 = vmatprep.mubr.msk.f32.mxu1 %vm253_vm0, %v243_v13 }
  0x58   : > { %1229 = vmatmul.mubr.msk.f32.gmra.mxu0 %vm253_vm0, %v240_v14  ;;  %1235 = vmatmul.mubr.msk.f32.gmra.mxu1 %vm253_vm0, %v244_v15 }
 0x114   : > { %v1629_v16 = vpop.f32.mrf.mxu0  ;;  %v1631_v17 = vpop.f32.mrf.mxu1 }
 0x115   : > { %676 = vrot.lane.b32.xlu1 %v1631_v17, %s1468_s20  ;;  %668 = vrot.lane.b32.xlu0 %v1629_v16, %s1468_s20 }
 0x116   : > { %v1637_v18 = vpop.f32.mrf.mxu0  ;;  %v1639_v19 = vpop.f32.mrf.mxu1 }
 0x118   : > { %v1641_v20 = vpop.f32.mrf.mxu0  ;;  %v1649_v22 = vpop.f32.mrf.mxu1 }
 0x119   : > { %666 = vrot.lane.b32.xlu0 %v1637_v18, %s1468_s20  ;;  %672 = vrot.lane.b32.xlu1 %v1641_v20, %s1468_s20 }
 0x11a   : > { %v1647_v21 = vpop.f32.mrf.mxu0  ;;  %v1655_v23 = vpop.f32.mrf.mxu1 }
 0x11d   : > { %674 = vrot.lane.b32.xlu0 %v1639_v19, %s1468_s20  ;;  %670 = vrot.lane.b32.xlu1 %v1647_v21, %s1468_s20 }
 0x121   : > { %678 = vrot.lane.b32.xlu0 %v1655_v23, %s1468_s20  ;;  %680 = vrot.lane.b32.xlu1 %v1649_v22, %s1468_s20 }
 0x187   : > { %v677_v26 = vpop.permute.xlu1 %676  ;;  %v669_v27 = vpop.permute.xlu0 %668 }
 0x188   : > { %v705_v28 = vsel %vm253_vm0, %v677_v26, 0.0  ;;  %v693_v29 = vsel %vm253_vm0, %v669_v27, 0.0  ;;  %v715_v30 = vsel %vm387_vm1, %v669_v27, 0.0  ;;  %v719_v34 = vsel %vm387_vm1, %v677_v26, 0.0 }
 0x189   : > { %706 = vadd.xlane.f32.xlu0 %v705_v28  ;;  %694 = vadd.xlane.f32.xlu1 %v693_v29  ;;  %v725_v33 = vsel %vm253_vm0, %v715_v30, 0.0  ;;  %v737_v36 = vsel %vm253_vm0, %v719_v34, 0.0 }
 0x18b   : > { %v667_v31 = vpop.permute.xlu0 %666  ;;  %v673_v32 = vpop.permute.xlu1 %672 }
 0x18c   : > { %v714_v38 = vsel %vm387_vm1, %v667_v31, 0.0  ;;  %v690_v40 = vsel %vm253_vm0, %v667_v31, 0.0  ;;  %v699_v43 = vsel %vm253_vm0, %v673_v32, 0.0  ;;  %v717_v50 = vsel %vm387_vm1, %v673_v32, 0.0 }
 0x18d   : > { %726 = vadd.xlane.f32.xlu0 %v725_v33  ;;  %v722_v41 = vsel %vm253_vm0, %v714_v38, 0.0  ;;  %v731_v52 = vsel %vm253_vm0, %v717_v50, 0.0 }
 0x18f   : > { %v675_v35 = vpop.permute.xlu0 %674  ;;  %v671_v39 = vpop.permute.xlu1 %670 }
 0x190   : > { %v702_v37 = vsel %vm253_vm0, %v675_v35, 0.0  ;;  %v718_v42 = vsel %vm387_vm1, %v675_v35, 0.0  ;;  %v716_v49 = vsel %vm387_vm1, %v671_v39, 0.0  ;;  %v696_v55 = vsel %vm253_vm0, %v671_v39, 0.0 }
 0x191   : > { %738 = vadd.xlane.f32.xlu0 %v737_v36  ;;  %703 = vadd.xlane.f32.xlu1 %v702_v37  ;;  %v734_v46 = vsel %vm253_vm0, %v718_v42, 0.0  ;;  %v728_v51 = vsel %vm253_vm0, %v716_v49, 0.0 }
 0x193   : > { %v679_v44 = vpop.permute.xlu0 %678  ;;  %v681_v45 = vpop.permute.xlu1 %680 }
 0x194   : > { %v708_v47 = vsel %vm253_vm0, %v679_v44, 0.0  ;;  %v711_v48 = vsel %vm253_vm0, %v681_v45, 0.0  ;;  %v720_v53 = vsel %vm387_vm1, %v679_v44, 0.0  ;;  %v721_v56 = vsel %vm387_vm1, %v681_v45, 0.0 }
 0x195   : > { %691 = vadd.xlane.f32.xlu0 %v690_v40  ;;  %723 = vadd.xlane.f32.xlu1 %v722_v41  ;;  %v740_v54 = vsel %vm253_vm0, %v720_v53, 0.0  ;;  %v743_v57 = vsel %vm253_vm0, %v721_v56, 0.0 }
 0x199   : > { %700 = vadd.xlane.f32.xlu0 %v699_v43  ;;  %735 = vadd.xlane.f32.xlu1 %v734_v46 }
 0x19d   : > { %709 = vadd.xlane.f32.xlu1 %v708_v47  ;;  %712 = vadd.xlane.f32.xlu0 %v711_v48 }
 0x1a1   : > { %729 = vadd.xlane.f32.xlu1 %v728_v51  ;;  %732 = vadd.xlane.f32.xlu0 %v731_v52 }
 0x1a5   : > { %741 = vadd.xlane.f32.xlu1 %v740_v54  ;;  %697 = vadd.xlane.f32.xlu0 %v696_v55 }
 0x1a9   : > { %744 = vadd.xlane.f32.xlu0 %v743_v57 }
 0x212   : > { %v707_v58 = vpop.xlane.xlu0 %706  ;;  %v695_v59 = vpop.xlane.xlu1 %694 }
 0x216   : > { %v727_v60 = vpop.xlane.xlu0 %726 }
 0x217   : > { %v755_v61 = vsub.f32 %v695_v59, %v727_v60  ;;  %v747_v62 = vmul.f32 0.03125, %v727_v60 }
 0x219   : > { %v763_v63 = vmul.f32 0.03125, %v755_v61 }
 0x21a   : > { %v739_v0 = vpop.xlane.xlu0 %738  ;;  %v704_v1 = vpop.xlane.xlu1 %703 }
 0x21b   : > { %v759_v2 = vsub.f32 %v707_v58, %v739_v0  ;;  %v771_v3 = vsel %vm387_vm1, %v747_v62, %v763_v63  ;;  %v751_v4 = vmul.f32 0.03125, %v739_v0 }
 0x21c   : > { %788 = vrot.lane.b32.xlu0 %v771_v3, %s1468_s20 }
 0x21d   : > { %v767_v5 = vmul.f32 0.03125, %v759_v2 }
 0x21e   : > { %v692_v6 = vpop.xlane.xlu0 %691  ;;  %v724_v7 = vpop.xlane.xlu1 %723 }
 0x21f   : > { %v754_v8 = vsub.f32 %v692_v6, %v724_v7  ;;  %v775_v9 = vsel %vm387_vm1, %v751_v4, %v767_v5  ;;  %v746_v10 = vmul.f32 0.03125, %v724_v7  ;;  %v391_v6 = vsel %vm253_vm0, %v1629_v16, 0.0 }
 0x220   : > { %796 = vrot.lane.b32.xlu1 %v775_v9, %s1468_s20  ;;  %v397_v7 = vsel %vm253_vm0, %v1641_v20, 0.0  ;;  %v409_v9 = vsel %vm253_vm0, %v1649_v22, 0.0 }
 0x221   : > { %v762_v11 = vmul.f32 0.03125, %v754_v8  ;;  %v403_v8 = vsel %vm253_vm0, %v1631_v17, 0.0 }
 0x222   : > { %v701_v12 = vpop.xlane.xlu0 %700  ;;  %v736_v13 = vpop.xlane.xlu1 %735 }
 0x223   : > { %v758_v14 = vsub.f32 %v704_v1, %v736_v13  ;;  %v770_v15 = vsel %vm387_vm1, %v746_v10, %v762_v11  ;;  %v750_v24 = vmul.f32 0.03125, %v736_v13  ;;  %v415_v10 = vsel %vm387_vm1, %v1629_v16, 0.0 }
 0x224   : > { %786 = vrot.lane.b32.xlu1 %v770_v15, %s1468_s20  ;;  %v425_v11 = vsel %vm253_vm0, %v415_v10, 0.0  ;;  %v394_v13 = vsel %vm253_vm0, %v1647_v21, 0.0 }
 0x225   : > { %v766_v26 = vmul.f32 0.03125, %v758_v14  ;;  %v400_v14 = vsel %vm253_vm0, %v1639_v19, 0.0 }
 0x226   : > { %v713_v27 = vpop.xlane.xlu0 %712  ;;  %v710_v28 = vpop.xlane.xlu1 %709 }
 0x227   : > { %v774_v29 = vsel %vm387_vm1, %v750_v24, %v766_v26  ;;  %v406_v24 = vsel %vm253_vm0, %v1655_v23, 0.0 }
 0x228   : > { %794 = vrot.lane.b32.xlu0 %v774_v29, %s1468_s20 }
 0x22a   : > { %v733_v30 = vpop.xlane.xlu0 %732  ;;  %v730_v31 = vpop.xlane.xlu1 %729 }
 0x22b   : > { %v749_v32 = vmul.f32 0.03125, %v733_v30  ;;  %v757_v33 = vsub.f32 %v701_v12, %v733_v30  ;;  %v748_v35 = vmul.f32 0.03125, %v730_v31  ;;  %v388_v12 = vsel %vm253_vm0, %v1637_v18, 0.0 }
 0x22d   : > { %v765_v34 = vmul.f32 0.03125, %v757_v33 }
 0x22e   : > { %v698_v36 = vpop.xlane.xlu0 %697  ;;  %v742_v37 = vpop.xlane.xlu1 %741 }
 0x22f   : > { %v756_v38 = vsub.f32 %v698_v36, %v730_v31  ;;  %v752_v39 = vmul.f32 0.03125, %v742_v37  ;;  %v760_v40 = vsub.f32 %v710_v28, %v742_v37  ;;  %v773_v41 = vsel %vm387_vm1, %v749_v32, %v765_v34 }
 0x230   : > { %792 = vrot.lane.b32.xlu1 %v773_v41, %s1468_s20 }
 0x231   : > { %v764_v42 = vmul.f32 0.03125, %v756_v38  ;;  %v768_v43 = vmul.f32 0.03125, %v760_v40 }
 0x232   : > { %v745_v44 = vpop.xlane.xlu0 %744 }
 0x233   : > { %v753_v45 = vmul.f32 0.03125, %v745_v44  ;;  %v761_v46 = vsub.f32 %v713_v27, %v745_v44  ;;  %v772_v47 = vsel %vm387_vm1, %v748_v35, %v764_v42  ;;  %v776_v48 = vsel %vm387_vm1, %v752_v39, %v768_v43 }
 0x234   : > { %790 = vrot.lane.b32.xlu1 %v772_v47, %s1468_s20  ;;  %798 = vrot.lane.b32.xlu0 %v776_v48, %s1468_s20  ;;  %v414_v27 = vsel %vm387_vm1, %v1637_v18, 0.0 }
 0x235   : > { %v769_v49 = vmul.f32 0.03125, %v761_v46  ;;  %v422_v30 = vsel %vm253_vm0, %v414_v27, 0.0 }
 0x237   : > { %v777_v50 = vsel %vm387_vm1, %v753_v45, %v769_v49 }
 0x238   : > { %800 = vrot.lane.b32.xlu1 %v777_v50, %s1468_s20 }
 0x28e   : > { %v789_v51 = vpop.permute.xlu0 %788 }
 0x28f   : > { %v1721_v52 = vsub.f32 %v1629_v16, %v789_v51 }
 0x291   : > { %v819_v53 = vmul.f32 %v1721_v52, %v1721_v52 }
 0x292   : > { %v797_v54 = vpop.permute.xlu1 %796 }
 0x293   : > { %v1726_v55 = vsub.f32 %v1631_v17, %v797_v54  ;;  %836 = vrot.lane.b32.xlu1 %v819_v53, %s1468_s20 }
 0x295   : > { %v823_v56 = vmul.f32 %v1726_v55, %v1726_v55 }
 0x296   : > { %v787_v57 = vpop.permute.xlu1 %786 }
 0x297   : > { %v1732_v58 = vsub.f32 %v1637_v18, %v787_v57  ;;  %844 = vrot.lane.b32.xlu1 %v823_v56, %s1468_s20 }
 0x299   : > { %v818_v59 = vmul.f32 %v1732_v58, %v1732_v58 }
 0x29a   : > { %v795_v60 = vpop.permute.xlu0 %794 }
 0x29b   : > { %v1738_v61 = vsub.f32 %v1639_v19, %v795_v60  ;;  %834 = vrot.lane.b32.xlu0 %v818_v59, %s1468_s20 }
 0x29d   : > { %v822_v62 = vmul.f32 %v1738_v61, %v1738_v61 }
 0x29f   : > { %842 = vrot.lane.b32.xlu0 %v822_v62, %s1468_s20 }
 0x2a2   : > { %v793_v63 = vpop.permute.xlu1 %792 }
 0x2a3   : > { %v1745_v0 = vsub.f32 %v1641_v20, %v793_v63 }
 0x2a5   : > { %v821_v1 = vmul.f32 %v1745_v0, %v1745_v0 }
 0x2a6   : > { %v791_v2 = vpop.permute.xlu1 %790  ;;  %v799_v26 = vpop.permute.xlu0 %798 }
 0x2a7   : > { %840 = vrot.lane.b32.xlu1 %v821_v1, %s1468_s20  ;;  %v1775_v15 = vsub.f32 %v1647_v21, %v791_v2  ;;  %v1783_v28 = vsub.f32 %v1655_v23, %v799_v26  ;;  %v421_v26 = vsel %vm387_vm1, %v1649_v22, 0.0 }
 0x2a9   : > { %v820_v29 = vmul.f32 %v1775_v15, %v1775_v15  ;;  %v824_v31 = vmul.f32 %v1783_v28, %v1783_v28 }
 0x2aa   : > { %v801_v3 = vpop.permute.xlu1 %800 }
 0x2ab   : > { %v1751_v4 = vsub.f32 %v1649_v22, %v801_v3 }
 0x2ad   : > { %v825_v5 = vmul.f32 %v1751_v4, %v1751_v4 }
 0x2af   : > { %848 = vrot.lane.b32.xlu1 %v825_v5, %s1468_s20 }
 0x2be   : > { %392 = vadd.xlane.f32.xlu0 %v391_v6  ;;  %v417_v6 = vsel %vm387_vm1, %v1641_v20, 0.0 }
 0x2c2   : > { %398 = vadd.xlane.f32.xlu0 %v397_v7 }
 0x2c6   : > { %404 = vadd.xlane.f32.xlu0 %v403_v8 }
 0x2ca   : > { %410 = vadd.xlane.f32.xlu0 %v409_v9  ;;  %v431_v9 = vsel %vm253_vm0, %v417_v6, 0.0 }
 0x2ce   : > { %426 = vadd.xlane.f32.xlu0 %v425_v11  ;;  %v419_v11 = vsel %vm387_vm1, %v1631_v17, 0.0 }
 0x2d3   : > { %389 = vadd.xlane.f32.xlu1 %v388_v12 }
 0x2d7   : > { %395 = vadd.xlane.f32.xlu1 %v394_v13 }
 0x2db   : > { %401 = vadd.xlane.f32.xlu1 %v400_v14  ;;  %v437_v14 = vsel %vm253_vm0, %v419_v11, 0.0 }
 0x2df   : > { %407 = vadd.xlane.f32.xlu1 %v406_v24 }
 0x2e3   : > { %423 = vadd.xlane.f32.xlu1 %v422_v30  ;;  %v443_v30 = vsel %vm253_vm0, %v421_v26, 0.0 }
 0x2e4   : > { %838 = vrot.lane.b32.xlu0 %v820_v29, %s1468_s20 }
 0x2e8   : > { %846 = vrot.lane.b32.xlu0 %v824_v31, %s1468_s20 }
 0x305   : > { %v837_v32 = vpop.permute.xlu1 %836 }
 0x306   : > { %v861_v33 = vsel %vm253_vm0, %v837_v32, 0.0  ;;  %v883_v36 = vsel %vm387_vm1, %v837_v32, 0.0  ;;  %v416_v32 = vsel %vm387_vm1, %v1647_v21, 0.0 }
 0x307   : > { %862 = vadd.xlane.f32.xlu1 %v861_v33  ;;  %v893_v38 = vsel %vm253_vm0, %v883_v36, 0.0  ;;  %v418_v36 = vsel %vm387_vm1, %v1639_v19, 0.0 }
 0x309   : > { %v845_v34 = vpop.permute.xlu1 %844 }
 0x30a   : > { %v873_v35 = vsel %vm253_vm0, %v845_v34, 0.0  ;;  %v887_v39 = vsel %vm387_vm1, %v845_v34, 0.0  ;;  %v428_v34 = vsel %vm253_vm0, %v416_v32, 0.0 }
 0x30b   : > { %874 = vadd.xlane.f32.xlu0 %v873_v35  ;;  %v905_v41 = vsel %vm253_vm0, %v887_v39, 0.0  ;;  %v434_v39 = vsel %vm253_vm0, %v418_v36, 0.0 }
 0x30d   : > { %v835_v37 = vpop.permute.xlu0 %834 }
 0x30e   : > { %v882_v43 = vsel %vm387_vm1, %v835_v37, 0.0  ;;  %v858_v44 = vsel %vm253_vm0, %v835_v37, 0.0 }
 0x30f   : > { %894 = vadd.xlane.f32.xlu0 %v893_v38  ;;  %v890_v45 = vsel %vm253_vm0, %v882_v43, 0.0 }
 0x311   : > { %v843_v40 = vpop.permute.xlu0 %842 }
 0x312   : > { %v870_v42 = vsel %vm253_vm0, %v843_v40, 0.0  ;;  %v886_v46 = vsel %vm387_vm1, %v843_v40, 0.0  ;;  %v420_v40 = vsel %vm387_vm1, %v1655_v23, 0.0 }
 0x313   : > { %906 = vadd.xlane.f32.xlu0 %v905_v41  ;;  %871 = vadd.xlane.f32.xlu1 %v870_v42  ;;  %v902_v49 = vsel %vm253_vm0, %v886_v46, 0.0  ;;  %v440_v43 = vsel %vm253_vm0, %v420_v40, 0.0  ;;  %v1874_v46 = vld [vmem:[%s2187_s3] ss:$0 sm:$0xff] }
 0x317   : > { %859 = vadd.xlane.f32.xlu0 %v858_v44  ;;  %891 = vadd.xlane.f32.xlu1 %v890_v45 }
 0x319   : > { %v841_v47 = vpop.permute.xlu1 %840 }
 0x31a   : > { %v867_v48 = vsel %vm253_vm0, %v841_v47, 0.0  ;;  %v885_v53 = vsel %vm387_vm1, %v841_v47, 0.0 }
 0x31b   : > { %868 = vadd.xlane.f32.xlu0 %v867_v48  ;;  %903 = vadd.xlane.f32.xlu1 %v902_v49  ;;  %v899_v54 = vsel %vm253_vm0, %v885_v53, 0.0 }
 0x321   : > { %v849_v50 = vpop.permute.xlu1 %848 }
 0x322   : > { %v879_v51 = vsel %vm253_vm0, %v849_v50, 0.0  ;;  %v889_v56 = vsel %vm387_vm1, %v849_v50, 0.0 }
 0x323   : > { %880 = vadd.xlane.f32.xlu0 %v879_v51  ;;  %v911_v57 = vsel %vm253_vm0, %v889_v56, 0.0 }
 0x327   : > { %900 = vadd.xlane.f32.xlu0 %v899_v54 }
 0x32b   : > { %912 = vadd.xlane.f32.xlu0 %v911_v57 }
 0x347   : > { %v393_v59 = vpop.xlane.xlu0 %392 }
 0x34b   : > { %v1816_v60 = vpop.xlane.xlu0 %398 }
 0x34f   : > { %v1818_v62 = vpop.xlane.xlu0 %404 }
 0x353   : > { %v1820_v63 = vpop.xlane.xlu0 %410 }
 0x357   : > { %v427_v1 = vpop.xlane.xlu0 %426 }
 0x358   : > { %v447_v48 = vmul.f32 0.03125, %v427_v1 }
 0x35b   : > { %v839_v2 = vpop.permute.xlu0 %838 }
 0x35c   : > { %v390_v3 = vpop.xlane.xlu1 %389  ;;  %v864_v5 = vsel %vm253_vm0, %v839_v2, 0.0  ;;  %v884_v12 = vsel %vm387_vm1, %v839_v2, 0.0 }
 0x35d   : > { %865 = vadd.xlane.f32.xlu0 %v864_v5  ;;  %v896_v24 = vsel %vm253_vm0, %v884_v12, 0.0 }
 0x35f   : > { %v847_v7 = vpop.permute.xlu0 %846 }
 0x360   : > { %v1826_v8 = vpop.xlane.xlu1 %395  ;;  %v876_v10 = vsel %vm253_vm0, %v847_v7, 0.0  ;;  %v888_v27 = vsel %vm387_vm1, %v847_v7, 0.0 }
 0x361   : > { %432 = vadd.xlane.f32.xlu0 %v431_v9  ;;  %877 = vadd.xlane.f32.xlu1 %v876_v10  ;;  %v908_v31 = vsel %vm253_vm0, %v888_v27, 0.0 }
 0x364   : > { %v1835_v13 = vpop.xlane.xlu1 %401 }
 0x365   : > { %438 = vadd.xlane.f32.xlu0 %v437_v14  ;;  %897 = vadd.xlane.f32.xlu1 %v896_v24 }
 0x368   : > { %v1844_v29 = vpop.xlane.xlu1 %407 }
 0x369   : > { %444 = vadd.xlane.f32.xlu0 %v443_v30  ;;  %909 = vadd.xlane.f32.xlu1 %v908_v31 }
 0x36c   : > { %v424_v33 = vpop.xlane.xlu1 %423 }
 0x36d   : > { %v454_v35 = vsub.f32 %v390_v3, %v424_v33  ;;  %429 = vadd.xlane.f32.xlu1 %v428_v34  ;;  %v446_v37 = vmul.f32 0.03125, %v424_v33 }
 0x36f   : > { %v462_v38 = vmul.f32 0.03125, %v454_v35 }
 0x371   : > { %435 = vadd.xlane.f32.xlu1 %v434_v39  ;;  %v470_v41 = vsel %vm387_vm1, %v446_v37, %v462_v38 }
 0x372   : > { %v1862_v42 = vsub.f32 %v1637_v18, %v470_v41  ;;  %v455_v18 = vsub.f32 %v393_v59, %v427_v1 }
 0x374   : > { %v1867_v44 = vmul.f32 %v1862_v42, %v1862_v42  ;;  %v463_v47 = vmul.f32 0.03125, %v455_v18 }
 0x375   : > { %441 = vadd.xlane.f32.xlu1 %v440_v43 }
 0x376   : > { %v494_v45 = vsel %vm253_vm0, %v1867_v44, 0.0  ;;  %v471_v49 = vsel %vm387_vm1, %v447_v48, %v463_v47 }
 0x377   : > { %v1881_v50 = vsub.f32 %v1629_v16, %v471_v49 }
 0x379   : > { %495 = vadd.xlane.f32.xlu1 %v494_v45  ;;  %v487_v51 = vmul.f32 %v1881_v50, %v1881_v50 }
 0x37b   : > { %v497_v53 = vsel %vm253_vm0, %v487_v51, 0.0 }
 0x37f   : > { %1026 = vrot.lane.b32.xlu0 %v1874_v46, %s1468_s20 }
 0x390   : > { %v1892_v1 = vpop.xlane.xlu1 %862 }
 0x394   : > { %v875_v54 = vpop.xlane.xlu0 %874 }
 0x398   : > { %v1886_v56 = vpop.xlane.xlu0 %894 }
 0x39c   : > { %v907_v57 = vpop.xlane.xlu0 %906  ;;  %v1896_v16 = vpop.xlane.xlu1 %871 }
 0x39e   : > { %498 = vadd.xlane.f32.xlu0 %v497_v53  ;;  %v927_v53 = vsub.f32 %v875_v54, %v907_v57 }
 0x3a0   : > { %v1888_v2 = vpop.xlane.xlu0 %859  ;;  %v1900_v6 = vpop.xlane.xlu1 %891  ;;  %v935_v54 = vmul.f32 0.03125, %v927_v53 }
 0x3a4   : > { %v1890_v59 = vpop.xlane.xlu0 %868  ;;  %v1904_v9 = vpop.xlane.xlu1 %903 }
 0x3ac   : > { %v1894_v3 = vpop.xlane.xlu0 %880 }
 0x3b0   : > { %v1898_v5 = vpop.xlane.xlu0 %900 }
 0x3b4   : > { %v1902_v7 = vpop.xlane.xlu0 %912 }
 0x3e6   : > { %v1906_v10 = vpop.xlane.xlu0 %865 }
 0x3ea   : > { %v433_v11 = vpop.xlane.xlu0 %432  ;;  %v1908_v12 = vpop.xlane.xlu1 %877 }
 0x3eb   : > { %v457_v14 = vsub.f32 %v1816_v60, %v433_v11  ;;  %v449_v26 = vmul.f32 0.03125, %v433_v11 }
 0x3ed   : > { %v465_v24 = vmul.f32 0.03125, %v457_v14 }
 0x3ee   : > { %v439_v27 = vpop.xlane.xlu0 %438  ;;  %v1911_v30 = vpop.xlane.xlu1 %897 }
 0x3ef   : > { %v459_v31 = vsub.f32 %v1818_v62, %v439_v27  ;;  %v473_v32 = vsel %vm387_vm1, %v449_v26, %v465_v24  ;;  %v451_v35 = vmul.f32 0.03125, %v439_v27 }
 0x3f0   : > { %v1917_v34 = vsub.f32 %v1641_v20, %v473_v32 }
 0x3f1   : > { %v467_v33 = vmul.f32 0.03125, %v459_v31 }
 0x3f2   : > { %v445_v36 = vpop.xlane.xlu0 %444  ;;  %v1919_v37 = vpop.xlane.xlu1 %909  ;;  %v489_v38 = vmul.f32 %v1917_v34, %v1917_v34 }
 0x3f3   : > { %v461_v60 = vsub.f32 %v1820_v63, %v445_v36  ;;  %v475_v39 = vsel %vm387_vm1, %v451_v35, %v467_v33  ;;  %v453_v62 = vmul.f32 0.03125, %v445_v36  ;;  %v922_v35 = vsub.f32 %v1888_v2, %v1900_v6 }
 0x3f4   : > { %v1927_v41 = vsub.f32 %v1631_v17, %v475_v39  ;;  %v503_v20 = vsel %vm253_vm0, %v489_v38, 0.0  ;;  %v519_v36 = vsel %vm387_vm1, %v487_v51, 0.0  ;;  %v925_v51 = vsub.f32 %v1890_v59, %v1898_v5 }
 0x3f5   : > { %v469_v40 = vmul.f32 0.03125, %v461_v60  ;;  %504 = vadd.xlane.f32.xlu1 %v503_v20  ;;  %v529_v2 = vsel %vm253_vm0, %v519_v36, 0.0  ;;  %v926_v36 = vsub.f32 %v1896_v16, %v1904_v9  ;;  %v928_v16 = vsub.f32 %v1908_v12, %v1919_v37 }
 0x3f6   : > { %v430_v43 = vpop.xlane.xlu1 %429  ;;  %v491_v63 = vmul.f32 %v1927_v41, %v1927_v41 }
 0x3f7   : > { %v456_v45 = vsub.f32 %v1826_v8, %v430_v43  ;;  %v477_v18 = vsel %vm387_vm1, %v453_v62, %v469_v40  ;;  %v448_v48 = vmul.f32 0.03125, %v430_v43  ;;  %v919_v62 = vmul.f32 0.03125, %v907_v57 }
 0x3f8   : > { %v1936_v47 = vsub.f32 %v1649_v22, %v477_v18  ;;  %v509_v17 = vsel %vm253_vm0, %v491_v63, 0.0  ;;  %v959_v43 = vadd.f32 1e-05, %v935_v54  ;;  %v521_v18 = vsel %vm387_vm1, %v489_v38, 0.0 }
 0x3f9   : > { %v464_v49 = vmul.f32 0.03125, %v456_v45  ;;  %510 = vadd.xlane.f32.xlu1 %v509_v17  ;;  %v930_v45 = vmul.f32 0.03125, %v922_v35  ;;  %v914_v17 = vmul.f32 0.03125, %v1900_v6  ;;  %v535_v53 = vsel %vm253_vm0, %v521_v18, 0.0 }
 0x3fa   : > { %v436_v11 = vpop.xlane.xlu1 %435  ;;  %v1941_v14 = vmul.f32 %v1936_v47, %v1936_v47  ;;  %1306 = vrsqrt.f32 %v959_v43  ;;  %v934_v43 = vmul.f32 0.03125, %v926_v36 }
 0x3fb   : > { %v458_v8 = vsub.f32 %v1835_v13, %v436_v11  ;;  %v472_v24 = vsel %vm387_vm1, %v448_v48, %v464_v49  ;;  %v450_v27 = vmul.f32 0.03125, %v436_v11  ;;  %v943_v49 = vadd.f32 1e-05, %v919_v62 }
 0x3fc   : > { %v515_v22 = vsel %vm253_vm0, %v1941_v14, 0.0  ;;  %v1949_v26 = vsub.f32 %v1647_v21, %v472_v24  ;;  %v954_v38 = vadd.f32 1e-05, %v930_v45  ;;  %v933_v11 = vmul.f32 0.03125, %v925_v51 }
 0x3fd   : > { %v466_v31 = vmul.f32 0.03125, %v458_v8  ;;  %516 = vadd.xlane.f32.xlu1 %v515_v22  ;;  %v929_v8 = vsub.f32 %v1894_v3, %v1902_v7  ;;  %1308 = vrsqrt.f32 %v943_v49  ;;  %v938_v24 = vadd.f32 1e-05, %v914_v17 }
 0x3fe   : > { %v442_v32 = vpop.xlane.xlu1 %441  ;;  %v488_v33 = vmul.f32 %v1949_v26, %v1949_v26  ;;  %v917_v22 = vmul.f32 0.03125, %v1898_v5  ;;  %1310 = vrsqrt.f32 %v954_v38  ;;  %v957_v54 = vadd.f32 1e-05, %v933_v11 }
 0x3ff   : > { %v460_v13 = vsub.f32 %v1844_v29, %v442_v32  ;;  %v474_v21 = vsel %vm387_vm1, %v450_v27, %v466_v31  ;;  %v452_v40 = vmul.f32 0.03125, %v442_v32  ;;  %v518_v27 = vsel %vm387_vm1, %v1867_v44, 0.0 }
 0x400   : > { %v500_v60 = vsel %vm253_vm0, %v488_v33, 0.0  ;;  %v1962_v39 = vsub.f32 %v1639_v19, %v474_v21  ;;  %v923_v31 = vsub.f32 %v1892_v1, %v1886_v56  ;;  %v924_v32 = vsub.f32 %v1906_v10, %v1911_v30 }
 0x401   : > { %v468_v20 = vmul.f32 0.03125, %v460_v13  ;;  %501 = vadd.xlane.f32.xlu0 %v500_v60  ;;  %530 = vadd.xlane.f32.xlu1 %v529_v2  ;;  %v526_v35 = vsel %vm253_vm0, %v518_v27, 0.0  ;;  %1312 = vrsqrt.f32 %v938_v24  ;;  %v941_v5 = vadd.f32 1e-05, %v917_v22 }
 0x402   : > { %v490_v29 = vmul.f32 %v1962_v39, %v1962_v39  ;;  %v921_v13 = vmul.f32 0.03125, %v1902_v7  ;;  %v520_v44 = vsel %vm387_vm1, %v488_v33, 0.0  ;;  %v931_v1 = vmul.f32 0.03125, %v923_v31 }
 0x403   : > { %v476_v19 = vsel %vm387_vm1, %v452_v40, %v468_v20  ;;  %1314 = vrsqrt.f32 %v957_v54  ;;  %v932_v60 = vmul.f32 0.03125, %v924_v32  ;;  %v915_v10 = vmul.f32 0.03125, %v1886_v56 }
 0x404   : > { %v506_v57 = vsel %vm253_vm0, %v490_v29, 0.0  ;;  %v1975_v48 = vsub.f32 %v1655_v23, %v476_v19  ;;  %v523_v23 = vsel %vm387_vm1, %v491_v63, 0.0  ;;  %v937_v63 = vmul.f32 0.03125, %v929_v8 }
 0x405   : > { %507 = vadd.xlane.f32.xlu0 %v506_v57  ;;  %536 = vadd.xlane.f32.xlu1 %v535_v53  ;;  %v541_v3 = vsel %vm253_vm0, %v523_v23, 0.0  ;;  %v532_v62 = vsel %vm253_vm0, %v520_v44, 0.0  ;;  %1316 = vrsqrt.f32 %v941_v5  ;;  %v945_v40 = vadd.f32 1e-05, %v921_v13 }
 0x406   : > { %v1981_v59 = vmul.f32 %v1975_v48, %v1975_v48  ;;  %v961_v21 = vadd.f32 1e-05, %v937_v63  ;;  %v916_v20 = vmul.f32 0.03125, %v1911_v30  ;;  %v522_v7 = vsel %vm387_vm1, %v490_v29, 0.0 }
 0x407   : > { %v955_v33 = vadd.f32 1e-05, %v931_v1  ;;  %v1307_v2 = vpop.eup %1306  ;;  %v956_v45 = vadd.f32 1e-05, %v932_v60  ;;  %v939_v51 = vadd.f32 1e-05, %v915_v10 }
 0x408   : > { %v512_v6 = vsel %vm253_vm0, %v1981_v59, 0.0  ;;  %1318 = vrsqrt.f32 %v961_v21  ;;  %v918_v56 = vmul.f32 0.03125, %v1904_v9  ;;  %v538_v18 = vsel %vm253_vm0, %v522_v7, 0.0  ;;  %v2019_v9 = vld [vmem:[%s2186_s2] ss:$0 sm:$0xff] }
 0x409   : > { %513 = vadd.xlane.f32.xlu0 %v512_v6  ;;  %542 = vadd.xlane.f32.xlu1 %v541_v3  ;;  %1320 = vrsqrt.f32 %v945_v40  ;;  %v940_v19 = vadd.f32 1e-05, %v916_v20  ;;  %v958_v57 = vadd.f32 1e-05, %v934_v43  ;;  %v936_v29 = vmul.f32 0.03125, %v928_v16 }
 0x40a   : > { %v1309_v30 = vpop.eup %1308  ;;  %1322 = vrsqrt.f32 %v955_v33  ;;  %v942_v17 = vadd.f32 1e-05, %v918_v56  ;;  %v920_v53 = vmul.f32 0.03125, %v1919_v37 }
 0x40b   : > { %1324 = vrsqrt.f32 %v956_v45  ;;  %v975_v49 = vsel %vm387_vm1, %v1309_v30, %v1307_v2  ;;  %v1311_v12 = vpop.eup %1310  ;;  %v960_v11 = vadd.f32 1e-05, %v936_v29  ;;  %v525_v2 = vsel %vm387_vm1, %v1941_v14, 0.0 }
 0x40c   : > { %1326 = vrsqrt.f32 %v939_v51  ;;  %v983_v8 = vmul.f32 %v2019_v9, %v975_v49  ;;  %v944_v24 = vadd.f32 1e-05, %v920_v53  ;;  %v524_v45 = vsel %vm387_vm1, %v1981_v59, 0.0 }
 0x40d   : > { %527 = vadd.xlane.f32.xlu0 %v526_v35  ;;  %1328 = vrsqrt.f32 %v940_v19  ;;  %v547_v51 = vsel %vm253_vm0, %v525_v2, 0.0  ;;  %v544_v56 = vsel %vm253_vm0, %v524_v45, 0.0  ;;  %v2059_v19 = vpop.permute.xlu0 %1026 }
 0x40e   : > { %v1313_v38 = vpop.eup %1312  ;;  %1330 = vrsqrt.f32 %v958_v57 }
 0x40f   : > { %v970_v23 = vsel %vm387_vm1, %v1313_v38, %v1311_v12  ;;  %1332 = vrsqrt.f32 %v942_v17 }
 0x410   : > { %v1315_v6 = vpop.eup %1314  ;;  %1334 = vrsqrt.f32 %v960_v11  ;;  %v978_v22 = vmul.f32 %v2019_v9, %v970_v23 }
 0x411   : > { %533 = vadd.xlane.f32.xlu0 %v532_v62  ;;  %1336 = vrsqrt.f32 %v944_v24 }
 0x412   : > { %v1317_v37 = vpop.eup %1316 }
 0x413   : > { %v973_v27 = vsel %vm387_vm1, %v1317_v37, %v1315_v6 }
 0x414   : > { %v981_v54 = vmul.f32 %v2019_v9, %v973_v27 }
 0x415   : > { %539 = vadd.xlane.f32.xlu0 %v538_v18  ;;  %v1319_v31 = vpop.eup %1318  ;;  %v496_v18 = vpop.xlane.xlu1 %495 }
 0x416   : > { %v1321_v3 = vpop.eup %1320 }
 0x417   : > { %v1323_v63 = vpop.eup %1322  ;;  %v977_v32 = vsel %vm387_vm1, %v1321_v3, %v1319_v31 }
 0x418   : > { %v1325_v35 = vpop.eup %1324  ;;  %v985_v44 = vmul.f32 %v2019_v9, %v977_v32 }
 0x419   : > { %v1327_v5 = vpop.eup %1326 }
 0x41a   : > { %1004 = vrot.lane.b32.xlu1 %v983_v8, %s1468_s20  ;;  %v1329_v13 = vpop.eup %1328  ;;  %v971_v1 = vsel %vm387_vm1, %v1327_v5, %v1323_v63 }
 0x41b   : > { %v1331_v36 = vpop.eup %1330  ;;  %v972_v21 = vsel %vm387_vm1, %v1329_v13, %v1325_v35  ;;  %v979_v10 = vmul.f32 %v2019_v9, %v971_v1 }
 0x41c   : > { %v1333_v60 = vpop.eup %1332  ;;  %v980_v62 = vmul.f32 %v2019_v9, %v972_v21 }
 0x41d   : > { %v974_v40 = vsel %vm387_vm1, %v1333_v60, %v1331_v36  ;;  %v1335_v20 = vpop.eup %1334 }
 0x41e   : > { %994 = vrot.lane.b32.xlu1 %v978_v22, %s1468_s20  ;;  %v1337_v7 = vpop.eup %1336  ;;  %v982_v33 = vmul.f32 %v2019_v9, %v974_v40 }
 0x41f   : > { %v976_v43 = vsel %vm387_vm1, %v1337_v7, %v1335_v20 }
 0x420   : > { %v984_v16 = vmul.f32 %v2019_v9, %v976_v43 }
 0x422   : > { %1000 = vrot.lane.b32.xlu1 %v981_v54, %s1468_s20 }
 0x426   : > { %1008 = vrot.lane.b32.xlu1 %v985_v44, %s1468_s20 }
 0x427   : > { %v499_v29 = vpop.xlane.xlu0 %498 }
 0x42a   : > { %998 = vrot.lane.b32.xlu1 %v980_v62, %s1468_s20 }
 0x42b   : > { %996 = vrot.lane.b32.xlu0 %v979_v10, %s1468_s20 }
 0x42f   : > { %1002 = vrot.lane.b32.xlu0 %v982_v33, %s1468_s20 }
 0x433   : > { %1006 = vrot.lane.b32.xlu0 %v984_v16, %s1468_s20 }
 0x44e   : > { %548 = vadd.xlane.f32.xlu1 %v547_v51 }
 0x452   : > { %545 = vadd.xlane.f32.xlu0 %v544_v56 }
 0x47e   : > { %v505_v30 = vpop.xlane.xlu1 %504 }
 0x482   : > { %v511_v57 = vpop.xlane.xlu1 %510 }
 0x486   : > { %v2061_v49 = vpop.xlane.xlu1 %516 }
 0x48a   : > { %v502_v12 = vpop.xlane.xlu0 %501  ;;  %v531_v14 = vpop.xlane.xlu1 %530 }
 0x48b   : > { %v551_v17 = vmul.f32 0.03125, %v531_v14  ;;  %v559_v53 = vsub.f32 %v499_v29, %v531_v14 }
 0x48d   : > { %v567_v59 = vmul.f32 0.03125, %v559_v53  ;;  %v575_v11 = vadd.f32 1e-05, %v551_v17 }
 0x48e   : > { %v508_v38 = vpop.xlane.xlu0 %507  ;;  %v537_v8 = vpop.xlane.xlu1 %536 }
 0x48f   : > { %v591_v23 = vadd.f32 1e-05, %v567_v59  ;;  %v553_v6 = vmul.f32 0.03125, %v537_v8  ;;  %v561_v24 = vsub.f32 %v505_v30, %v537_v8  ;;  %1338 = vrsqrt.f32 %v575_v11 }
 0x491   : > { %1340 = vrsqrt.f32 %v591_v23  ;;  %v569_v22 = vmul.f32 0.03125, %v561_v24  ;;  %v577_v27 = vadd.f32 1e-05, %v553_v6 }
 0x492   : > { %v2063_v37 = vpop.xlane.xlu0 %513  ;;  %v543_v31 = vpop.xlane.xlu1 %542 }
 0x493   : > { %v593_v3 = vadd.f32 1e-05, %v569_v22  ;;  %v555_v54 = vmul.f32 0.03125, %v543_v31  ;;  %v563_v63 = vsub.f32 %v511_v57, %v543_v31  ;;  %1342 = vrsqrt.f32 %v577_v27 }
 0x495   : > { %1344 = vrsqrt.f32 %v593_v3  ;;  %v571_v35 = vmul.f32 0.03125, %v563_v63  ;;  %v579_v5 = vadd.f32 1e-05, %v555_v54 }
 0x496   : > { %v528_v32 = vpop.xlane.xlu0 %527  ;;  %v1005_v1 = vpop.permute.xlu1 %1004 }
 0x497   : > { %v550_v13 = vmul.f32 0.03125, %v528_v32  ;;  %v558_v44 = vsub.f32 %v496_v18, %v528_v32  ;;  %v595_v36 = vadd.f32 1e-05, %v571_v35  ;;  %v1023_v60 = vmul.f32 %v1005_v1, %v1726_v55 }
 0x498   : > { %1346 = vrsqrt.f32 %v579_v5 }
 0x499   : > { %v574_v21 = vadd.f32 1e-05, %v550_v13  ;;  %v566_v10 = vmul.f32 0.03125, %v558_v44  ;;  %1348 = vrsqrt.f32 %v595_v36  ;;  %v1034_v40 = vadd.f32 %v2059_v19, %v1023_v60 }
 0x49a   : > { %v534_v62 = vpop.xlane.xlu0 %533  ;;  %v995_v43 = vpop.permute.xlu1 %994 }
 0x49b   : > { %v552_v20 = vmul.f32 0.03125, %v534_v62  ;;  %v560_v7 = vsub.f32 %v502_v12, %v534_v62  ;;  %v590_v33 = vadd.f32 1e-05, %v566_v10  ;;  %1350 = vrsqrt.f32 %v574_v21  ;;  %1055 = vrot.lane.b32.xlu0 %v1034_v40, %s1468_s20 }
 0x49c   : > { %v1018_v45 = vmul.f32 %v995_v43, %v1732_v58  ;;  %v1339_v51 = vpop.eup %1338 }
 0x49d   : > { %v568_v16 = vmul.f32 0.03125, %v560_v7  ;;  %v576_v2 = vadd.f32 1e-05, %v552_v20  ;;  %1352 = vrsqrt.f32 %v590_v33 }
 0x49e   : > { %v540_v55 = vpop.xlane.xlu0 %539  ;;  %v1029_v18 = vadd.f32 %v2059_v19, %v1018_v45  ;;  %v1341_v57 = vpop.eup %1340 }
 0x49f   : > { %v592_v56 = vadd.f32 1e-05, %v568_v16  ;;  %v554_v30 = vmul.f32 0.03125, %v540_v55  ;;  %1354 = vrsqrt.f32 %v576_v2  ;;  %v562_v29 = vsub.f32 %v508_v38, %v540_v55  ;;  %v1001_v12 = vpop.permute.xlu1 %1000 }
 0x4a0   : > { %v607_v14 = vsel %vm387_vm1, %v1339_v51, %v1341_v57  ;;  %v1021_v17 = vmul.f32 %v1001_v12, %v1745_v0  ;;  %1045 = vrot.lane.b32.xlu0 %v1029_v18, %s1468_s20  ;;  %v1343_v8 = vpop.eup %1342 }
 0x4a1   : > { %1356 = vrsqrt.f32 %v592_v56  ;;  %v578_v58 = vadd.f32 1e-05, %v554_v30  ;;  %v621_v53 = vmul.f32 %v2019_v9, %v607_v14  ;;  %v570_v59 = vmul.f32 0.03125, %v562_v29 }
 0x4a2   : > { %v997_v11 = vpop.permute.xlu0 %996  ;;  %v1032_v23 = vadd.f32 %v2059_v19, %v1021_v17  ;;  %v1345_v6 = vpop.eup %1344 }
 0x4a3   : > { %v1019_v38 = vmul.f32 %v997_v11, %v1721_v52  ;;  %v629_v24 = vmul.f32 %v621_v53, %v1881_v50  ;;  %v594_v22 = vadd.f32 1e-05, %v570_v59  ;;  %v1009_v27 = vpop.permute.xlu1 %1008  ;;  %v609_v0 = vsel %vm387_vm1, %v1343_v8, %v1345_v6 }
 0x4a4   : > { %1358 = vrsqrt.f32 %v578_v58  ;;  %v1025_v3 = vmul.f32 %v1009_v27, %v1751_v4  ;;  %1051 = vrot.lane.b32.xlu0 %v1032_v23, %s1468_s20  ;;  %v623_v50 = vmul.f32 %v2019_v9, %v609_v0 }
 0x4a5   : > { %v1030_v31 = vadd.f32 %v2059_v19, %v1019_v38  ;;  %v643_v52 = vadd.f32 %v1874_v46, %v629_v24  ;;  %1360 = vrsqrt.f32 %v594_v22  ;;  %v1347_v63 = vpop.eup %1346 }
 0x4a6   : > { %v1003_v54 = vpop.permute.xlu0 %1002  ;;  %v1036_v32 = vadd.f32 %v2059_v19, %v1025_v3  ;;  %v1349_v5 = vpop.eup %1348  ;;  %v631_v4 = vmul.f32 %v623_v50, %v1917_v34 }
 0x4a7   : > { %v1022_v35 = vmul.f32 %v1003_v54, %v1738_v61  ;;  %1047 = vrot.lane.b32.xlu1 %v1030_v31, %s1468_s20  ;;  %651 = vst.msk [vmem:[%s2084_s24 + $0x10] sm:$0xff] %vm253_vm0, %v643_v52  ;;  %v999_v13 = vpop.permute.xlu1 %998  ;;  %v611_v44 = vsel %vm387_vm1, %v1347_v63, %v1349_v5 }
 0x4a8   : > { %v1020_v36 = vmul.f32 %v999_v13, %v1775_v15  ;;  %1059 = vrot.lane.b32.xlu0 %v1036_v32, %s1468_s20  ;;  %v1351_v21 = vpop.eup %1350  ;;  %v645_v61 = vadd.f32 %v1874_v46, %v631_v4  ;;  %v625_v60 = vmul.f32 %v2019_v9, %v611_v44 }
 0x4a9   : > { %v1033_v1 = vadd.f32 %v2059_v19, %v1022_v35 }
 0x4aa   : > { %v1007_v10 = vpop.permute.xlu0 %1006  ;;  %v1353_v62 = vpop.eup %1352  ;;  %653 = vst.msk [vmem:[%s2084_s24 + $0x30] sm:$0xff] %vm253_vm0, %v645_v61  ;;  %v633_v34 = vmul.f32 %v625_v60, %v1927_v41  ;;  %v1031_v7 = vadd.f32 %v2059_v19, %v1020_v36 }
 0x4ab   : > { %1053 = vrot.lane.b32.xlu1 %v1033_v1, %s1468_s20  ;;  %v606_v40 = vsel %vm387_vm1, %v1351_v21, %v1353_v62  ;;  %v1024_v33 = vmul.f32 %v1007_v10, %v1783_v28 }
 0x4ac   : > { %v1355_v15 = vpop.eup %1354  ;;  %v620_v20 = vmul.f32 %v2019_v9, %v606_v40  ;;  %v647_v16 = vadd.f32 %v1874_v46, %v633_v34 }
 0x4ad   : > { %v1035_v28 = vadd.f32 %v2059_v19, %v1024_v33 }
 0x4ae   : > { %v1357_v43 = vpop.eup %1356  ;;  %v628_v2 = vmul.f32 %v620_v20, %v1862_v42  ;;  %655 = vst.msk [vmem:[%s2084_s24 + $0x50] sm:$0xff] %vm253_vm0, %v647_v16 }
 0x4af   : > { %v608_v41 = vsel %vm387_vm1, %v1355_v15, %v1357_v43  ;;  %1049 = vrot.lane.b32.xlu1 %v1031_v7, %s1468_s20 }
 0x4b0   : > { %v622_v45 = vmul.f32 %v2019_v9, %v608_v41  ;;  %v642_v55 = vadd.f32 %v1874_v46, %v628_v2 }
 0x4b1   : > { %v1359_v51 = vpop.eup %1358 }
 0x4b2   : > { %v630_v56 = vmul.f32 %v622_v45, %v1949_v26  ;;  %v1361_v18 = vpop.eup %1360  ;;  %650 = vst.msk [vmem:[%s2084_s24] sm:$0xff] %vm253_vm0, %v642_v55 }
 0x4b3   : > { %1057 = vrot.lane.b32.xlu1 %v1035_v28, %s1468_s20  ;;  %v610_v30 = vsel %vm387_vm1, %v1359_v51, %v1361_v18 }
 0x4b4   : > { %v644_v42 = vadd.f32 %v1874_v46, %v630_v56  ;;  %v624_v57 = vmul.f32 %v2019_v9, %v610_v30 }
 0x4b6   : > { %652 = vst.msk [vmem:[%s2084_s24 + $0x20] sm:$0xff] %vm253_vm0, %v644_v42  ;;  %v632_v29 = vmul.f32 %v624_v57, %v1962_v39 }
 0x4b8   : > { %v646_v19 = vadd.f32 %v1874_v46, %v632_v29 }
 0x4ba   : > { %654 = vst.msk [vmem:[%s2084_s24 + $0x40] sm:$0xff] %vm253_vm0, %v646_v19 }
 0x4d7   : > { %v549_v26 = vpop.xlane.xlu1 %548 }
 0x4d8   : > { %v557_v12 = vmul.f32 0.03125, %v549_v26  ;;  %v565_v14 = vsub.f32 %v2061_v49, %v549_v26 }
 0x4da   : > { %v573_v17 = vmul.f32 0.03125, %v565_v14  ;;  %v581_v53 = vadd.f32 1e-05, %v557_v12 }
 0x4db   : > { %v546_v58 = vpop.xlane.xlu0 %545 }
 0x4dc   : > { %v556_v59 = vmul.f32 0.03125, %v546_v58  ;;  %v564_v11 = vsub.f32 %v2063_v37, %v546_v58  ;;  %v597_v8 = vadd.f32 1e-05, %v573_v17  ;;  %1362 = vrsqrt.f32 %v581_v53 }
 0x4de   : > { %v572_v23 = vmul.f32 0.03125, %v564_v11  ;;  %v580_v38 = vadd.f32 1e-05, %v556_v59  ;;  %1364 = vrsqrt.f32 %v597_v8 }
 0x4e0   : > { %v596_v39 = vadd.f32 1e-05, %v572_v23  ;;  %1366 = vrsqrt.f32 %v580_v38 }
 0x4e2   : > { %1368 = vrsqrt.f32 %v596_v39 }
 0x4e9   : > { %v1363_v6 = vpop.eup %1362 }
 0x4eb   : > { %v1365_v24 = vpop.eup %1364 }
 0x4ec   : > { %v613_v22 = vsel %vm387_vm1, %v1363_v6, %v1365_v24 }
 0x4ed   : > { %v1367_v49 = vpop.eup %1366  ;;  %v627_v27 = vmul.f32 %v2019_v9, %v613_v22 }
 0x4ef   : > { %v1369_v37 = vpop.eup %1368  ;;  %v635_v31 = vmul.f32 %v627_v27, %v1936_v47 }
 0x4f0   : > { %v612_v0 = vsel %vm387_vm1, %v1367_v49, %v1369_v37 }
 0x4f1   : > { %v626_v3 = vmul.f32 %v2019_v9, %v612_v0  ;;  %v649_v52 = vadd.f32 %v1874_v46, %v635_v31 }
 0x4f3   : > { %v634_v50 = vmul.f32 %v626_v3, %v1975_v48  ;;  %657 = vst.msk [vmem:[%s2084_s24 + $0x70] sm:$0xff] %vm253_vm0, %v649_v52 }
 0x4f5   : > { %v648_v54 = vadd.f32 %v1874_v46, %v634_v50 }
 0x4f7   : > { %656 = vst.msk [vmem:[%s2084_s24 + $0x60] sm:$0xff] %vm253_vm0, %v648_v54 }
 0x50d   : > { %v1056_v25 = vpop.permute.xlu0 %1055 }
 0x50e   : > { %1186 = vst.msk [vmem:[%s2084_s24 + $0x58] sm:$0xff] %vm253_vm0, %v1056_v25 }
 0x512   : > { %v1046_v47 = vpop.permute.xlu0 %1045 }
 0x513   : > { %1181 = vst.msk [vmem:[%s2084_s24 + $0x8] sm:$0xff] %vm253_vm0, %v1046_v47 }
 0x516   : > { %v1052_v9 = vpop.permute.xlu0 %1051 }
 0x517   : > { %1184 = vst.msk [vmem:[%s2084_s24 + $0x38] sm:$0xff] %vm253_vm0, %v1052_v9 }
 0x519   : > { %v1048_v63 = vpop.permute.xlu1 %1047 }
 0x51a   : > { %1182 = vst.msk [vmem:[%s2084_s24 + $0x18] sm:$0xff] %vm253_vm0, %v1048_v63  ;;  %v1060_v48 = vpop.permute.xlu0 %1059 }
 0x51b   : > { %1188 = vst.msk [vmem:[%s2084_s24 + $0x78] sm:$0xff] %vm253_vm0, %v1060_v48 }
 0x51d   : > { %v1054_v32 = vpop.permute.xlu1 %1053 }
 0x51e   : > { %1185 = vst.msk [vmem:[%s2084_s24 + $0x48] sm:$0xff] %vm253_vm0, %v1054_v32 }
 0x521   : > { %v1050_v46 = vpop.permute.xlu1 %1049 }
 0x522   : > { %1183 = vst.msk [vmem:[%s2084_s24 + $0x28] sm:$0xff] %vm253_vm0, %v1050_v46 }
 0x525   : > { %v1058_v35 = vpop.permute.xlu1 %1057 }
 0x526   : > { %1187 = vst.msk [vmem:[%s2084_s24 + $0x68] sm:$0xff] %vm253_vm0, %v1058_v35 }
 0x527 PF: > { %p15_p7 = scmp.ge.s32.totalorder %s1541_s26, 4   ;;  %s2201_s15 = smov %s1454_s16 }
 0x528   : > { %s2202_s16 = smov %s1458_s17  ;;  %s2203_s17 = smov %s1561_s8 }
 0x529   : > { %s2204_s18 = smov %s1541_s26  ;;  %17 = sbr.rel (!%p15_p7) target bundleno = 4 (0x4), region = 81 }
 0x52e   :  { %1102 = vsyncpa [#allocation3], 1 }
 0x52f   :  { %1104 = vsyncpa [#allocation3 + $0x1], 1 }
 0x530   :  { %1105 = vsyncpa [#allocation5], 1 }

</bundles_post_ra>
